<compile_context>
chip_gen: v6e
topology: v6e:2x2x1
jax: 0.10.0
libtpu: 0.0.40
codegen_flags: <defaults>
</compile_context>

<pallas_src>
import jax
import jax.numpy as jnp
import numpy as np
from jax import lax
from jax.experimental import pallas as pl
from jax.experimental.pallas import tpu as pltpu

NUM_GROUPS = 32
EPS = 1e-6


def attn_block_kernel(x_ref, gmat_ref, gmat_t_ref, gamma_ref, beta_ref,
                      wqkv_ref, bqkv_ref, wp_ref, bp_ref,
                      o_ref, qkv_ref):
    C = x_ref.shape[1]
    T = x_ref.shape[2]
    TQ = o_ref.shape[2]
    qi = pl.program_id(1)

    # -------- per-batch prologue: GroupNorm + fused QKV projection (runs at qi == 0) --------
    @pl.when(qi == 0)
    def _():
        x = x_ref[0]                                     # (C, T) f32
        n = jnp.float32((C // NUM_GROUPS) * T)
        # two-pass (centered) group statistics via tiny group-membership matmuls
        ch_sum = jnp.sum(x, axis=1, keepdims=True)       # (C, 1)
        g_mean = jnp.dot(gmat_ref[...], ch_sum,
                         preferred_element_type=jnp.float32) / n          # (G, 1)
        mean_c = jnp.dot(gmat_t_ref[...], g_mean,
                         preferred_element_type=jnp.float32)              # (C, 1)
        xc = x - mean_c
        sq_sum = jnp.sum(xc * xc, axis=1, keepdims=True)                  # (C, 1)
        g_var = jnp.dot(gmat_ref[...], sq_sum,
                        preferred_element_type=jnp.float32) / n           # (G, 1)
        g_inv = lax.rsqrt(g_var + EPS)
        inv_c = jnp.dot(gmat_t_ref[...], g_inv,
                        preferred_element_type=jnp.float32)               # (C, 1)
        h = (xc * inv_c) * gamma_ref[...] + beta_ref[...]                 # (C, T) f32

        # fused q/k/v: one bf16 MXU matmul with f32 accumulation
        qkv = jnp.dot(wqkv_ref[...], h.astype(jnp.bfloat16),
                      preferred_element_type=jnp.float32) + bqkv_ref[...]  # (3C, T)
        qkv_ref[...] = qkv.astype(jnp.bfloat16)          # cached for all q tiles of this batch

    # -------- attention for this query tile --------
    q_start = pl.multiple_of(qi * TQ, TQ)
    q_t = qkv_ref[0:C, pl.ds(q_start, TQ)]               # (C, TQ) bf16
    k = qkv_ref[C:2 * C, :]                              # (C, T)  bf16
    v = qkv_ref[2 * C:3 * C, :]                          # (C, T)  bf16

    scale = float(C) ** -0.5
    # scores (TQ, T): contract the channel dim of both operands (no materialized transpose)
    s = lax.dot_general(q_t, k, (((0,), (0,)), ((), ())),
                        preferred_element_type=jnp.float32) * scale
    s = s - jnp.max(s, axis=-1, keepdims=True)
    e = jnp.exp(s)
    inv = pl.reciprocal(jnp.sum(e, axis=-1, keepdims=True), approx=True)
    p = (e * inv).astype(jnp.bfloat16)                    # (TQ, T) softmax probs

    # attn[c, tq] = sum_tk v[c, tk] * p[tq, tk]  (contract last dims, no transpose)
    attn = lax.dot_general(v, p, (((1,), (1,)), ((), ())),
                           preferred_element_type=jnp.float32)            # (C, TQ)

    out = jnp.dot(wp_ref[...], attn.astype(jnp.bfloat16),
                  preferred_element_type=jnp.float32) + bp_ref[...]       # (C, TQ)

    x_tile = x_ref[0, :, pl.ds(q_start, TQ)]              # (C, TQ) f32 residual slab
    o_ref[0] = x_tile + out


def _pick_tq(T):
    for cand in (512, 256, 128):
        if T % cand == 0:
            return cand
    return T


def attn_block(x, params, *, tq=None):
    B, C, T = x.shape
    gamma, beta, wq, bq, wk, bk, wv, bv, wp, bp = params
    G = NUM_GROUPS
    assert C % G == 0, "in_channels must be divisible by num_groups=32"
    cpg = C // G

    if tq is None:
        tq = _pick_tq(T)
    assert T % tq == 0, "T must be a multiple of the query tile"
    nq = T // tq

    # host-side prep: fused QKV weight (bf16), bf16 proj weight, group-membership matrices
    wqkv = jnp.concatenate([wq, wk, wv], axis=0).astype(jnp.bfloat16)     # (3C, C)
    bqkv = jnp.concatenate([bq, bk, bv], axis=0).astype(jnp.float32)      # (3C, 1)
    wp_b = wp.astype(jnp.bfloat16)                                        # (C, C)
    ch = jnp.arange(C, dtype=jnp.int32)
    gmat = (ch[None, :] // cpg ==
            jnp.arange(G, dtype=jnp.int32)[:, None]).astype(jnp.float32)  # (G, C)
    gmat_t = gmat.T                                                       # (C, G)

    x_spec = pl.BlockSpec((1, C, T), lambda b, q: (b, 0, 0))
    out_spec = pl.BlockSpec((1, C, tq), lambda b, q: (b, 0, q))

    def const(shape):
        return pl.BlockSpec(shape, lambda b, q: (0, 0))

    return pl.pallas_call(
        attn_block_kernel,
        out_shape=jax.ShapeDtypeStruct((B, C, T), jnp.float32),
        grid_spec=pltpu.PrefetchScalarGridSpec(
            num_scalar_prefetch=0,
            grid=(B, nq),
            in_specs=[x_spec,
                      const((G, C)), const((C, G)),       # group_mat, group_mat^T
                      const((C, 1)), const((C, 1)),       # gamma, beta
                      const((3 * C, C)), const((3 * C, 1)),  # fused QKV weight / bias
                      const((C, C)), const((C, 1))],      # proj weight / bias
            out_specs=out_spec,
            scratch_shapes=[pltpu.VMEM((3 * C, T), jnp.bfloat16)],
        ),
        compiler_params=pltpu.CompilerParams(
            dimension_semantics=("parallel", "arbitrary"),
            vmem_limit_bytes=64 * 1024 * 1024,
        ),
    )(x, gmat, gmat_t, gamma, beta, wqkv, bqkv, wp_b, bp)


def attn_block_ref(x, params):
    """Pure-JAX f32 reference mirroring the PyTorch forward."""
    gamma, beta, wq, bq, wk, bk, wv, bv, wp, bp = params
    B, C, T = x.shape
    G = NUM_GROUPS
    xg = x.reshape(B, G, C // G * T)
    mean = xg.mean(axis=-1, keepdims=True)
    var = xg.var(axis=-1, keepdims=True)
    h = ((xg - mean) / jnp.sqrt(var + EPS)).reshape(B, C, T)
    h = h * gamma.reshape(1, C, 1) + beta.reshape(1, C, 1)

    q = jnp.einsum("oc,bct->bot", wq, h) + bq.reshape(1, C, 1)
    k = jnp.einsum("oc,bct->bot", wk, h) + bk.reshape(1, C, 1)
    v = jnp.einsum("oc,bct->bot", wv, h) + bv.reshape(1, C, 1)

    w = jnp.einsum("bcq,bck->bqk", q, k) * (C ** -0.5)
    w = jax.nn.softmax(w, axis=2)
    h_ = jnp.einsum("bck,bqk->bcq", v, w)
    h_ = jnp.einsum("oc,bct->bot", wp, h_) + bp.reshape(1, C, 1)
    return x + h_


if __name__ == "__main__":
    B, C, T = 2, 64, 256  # C divisible by 32; T divisible by the 128 query tile

    key = jax.random.PRNGKey(0)
    keys = jax.random.split(key, 11)

    x = jax.random.normal(keys[0], (B, C, T), dtype=jnp.float32)

    def mk_mat(k):
        return jax.random.normal(k, (C, C), dtype=jnp.float32) * 0.05

    def mk_vec(k):
        return jax.random.normal(k, (C, 1), dtype=jnp.float32) * 0.05

    gamma = jnp.ones((C, 1), jnp.float32) + 0.1 * jax.random.normal(keys[1], (C, 1), jnp.float32)
    beta = 0.1 * jax.random.normal(keys[2], (C, 1), jnp.float32)
    wq, bq = mk_mat(keys[3]), mk_vec(keys[4])
    wk, bk = mk_mat(keys[5]), mk_vec(keys[6])
    wv, bv = mk_mat(keys[7]), mk_vec(keys[8])
    wp, bp = mk_mat(keys[9]), mk_vec(keys[10])

    params = (gamma, beta, wq, bq, wk, bk, wv, bv, wp, bp)

    out = jax.block_until_ready(attn_block(x, params))
    ref = jax.block_until_ready(attn_block_ref(x, params))

    # bf16 matmul operands (f32 accumulation) -> relaxed tolerance vs the f32 reference
    np.testing.assert_allclose(np.asarray(out), np.asarray(ref), rtol=2e-2, atol=2e-2)

    print("KERNEL_OK")
</pallas_src>

<mosaic_0001>
module attributes {stable_mosaic.version = 11 : i64} {
  func.func @attn_block_kernel(%arg0: i32, %arg1: i32, %arg2: memref<1x64x256xf32, #tpu.memory_space<vmem>>, %arg3: memref<32x64xf32, #tpu.memory_space<vmem>>, %arg4: memref<64x32xf32, #tpu.memory_space<vmem>>, %arg5: memref<64x1xf32, #tpu.memory_space<vmem>>, %arg6: memref<64x1xf32, #tpu.memory_space<vmem>>, %arg7: memref<192x64xbf16, #tpu.memory_space<vmem>>, %arg8: memref<192x1xf32, #tpu.memory_space<vmem>>, %arg9: memref<64x64xbf16, #tpu.memory_space<vmem>>, %arg10: memref<64x1xf32, #tpu.memory_space<vmem>>, %arg11: memref<1x64x256xf32, #tpu.memory_space<vmem>>, %arg12: memref<192x256xbf16, #tpu.memory_space<vmem>>) attributes {dimension_semantics = [#tpu.dimension_semantics<parallel>, #tpu.dimension_semantics<arbitrary>], iteration_bounds = array<i64: 2, 1>, scalar_prefetch = 0 : i64, scratch_operands = 1 : i64, tpu.core_type = #tpu.core_type<tc>, window_params = [{transform_indices = @transform_0, window_bounds = array<i64: 1, 64, 256>}, {pipeline_mode = #tpu.pipeline_mode<synchronous>, transform_indices = @transform_1, window_bounds = array<i64: 32, 64>}, {pipeline_mode = #tpu.pipeline_mode<synchronous>, transform_indices = @transform_2, window_bounds = array<i64: 64, 32>}, {pipeline_mode = #tpu.pipeline_mode<synchronous>, transform_indices = @transform_3, window_bounds = array<i64: 64, 1>}, {pipeline_mode = #tpu.pipeline_mode<synchronous>, transform_indices = @transform_4, window_bounds = array<i64: 64, 1>}, {pipeline_mode = #tpu.pipeline_mode<synchronous>, transform_indices = @transform_5, window_bounds = array<i64: 192, 64>}, {pipeline_mode = #tpu.pipeline_mode<synchronous>, transform_indices = @transform_6, window_bounds = array<i64: 192, 1>}, {pipeline_mode = #tpu.pipeline_mode<synchronous>, transform_indices = @transform_7, window_bounds = array<i64: 64, 64>}, {pipeline_mode = #tpu.pipeline_mode<synchronous>, transform_indices = @transform_8, window_bounds = array<i64: 64, 1>}, {transform_indices = @transform_9, window_bounds = array<i64: 1, 64, 256>}]} {
    %c0_i32 = arith.constant 0 : i32
    %0 = arith.cmpi eq, %arg1, %c0_i32 : i32
    %1 = arith.extui %0 : i1 to i32
    %c0_i32_0 = arith.constant 0 : i32
    %2 = arith.cmpi ne, %1, %c0_i32_0 : i32
    scf.if %2 {
      %c0_17 = arith.constant 0 : index
      %c0_18 = arith.constant 0 : index
      %c0_19 = arith.constant 0 : index
      %37 = vector.load %arg2[%c0_17, %c0_18, %c0_19] : memref<1x64x256xf32, #tpu.memory_space<vmem>>, vector<1x64x256xf32>
      %38 = vector.shape_cast %37 : vector<1x64x256xf32> to vector<64x256xf32>
      %cst_20 = arith.constant dense<0.000000e+00> : vector<64xf32>
      %39 = vector.multi_reduction <add>, %38, %cst_20 [1] : vector<64x256xf32> to vector<64xf32>
      %40 = vector.shape_cast %39 : vector<64xf32> to vector<64x1xf32>
      %c0_21 = arith.constant 0 : index
      %c0_22 = arith.constant 0 : index
      %41 = vector.load %arg3[%c0_21, %c0_22] : memref<32x64xf32, #tpu.memory_space<vmem>>, vector<32x64xf32>
      %cst_23 = arith.constant dense<0.000000e+00> : vector<32x1xf32>
      %42 = tpu.matmul %41, %40, %cst_23 {dimension_numbers = #tpu.dot_dimension_numbers<[1], [0], [0], [1], [0, 0, 1, 1], [], []>} : vector<32x64xf32>, vector<64x1xf32>, vector<32x1xf32> -> vector<32x1xf32>
      %cst_24 = arith.constant 5.120000e+02 : f32
      %43 = vector.broadcast %cst_24 : f32 to vector<32x1xf32>
      %44 = arith.divf %42, %43 : vector<32x1xf32>
      %c0_25 = arith.constant 0 : index
      %c0_26 = arith.constant 0 : index
      %45 = vector.load %arg4[%c0_25, %c0_26] : memref<64x32xf32, #tpu.memory_space<vmem>>, vector<64x32xf32>
      %cst_27 = arith.constant dense<0.000000e+00> : vector<64x1xf32>
      %46 = tpu.matmul %45, %44, %cst_27 {dimension_numbers = #tpu.dot_dimension_numbers<[1], [0], [0], [1], [0, 0, 1, 1], [], []>} : vector<64x32xf32>, vector<32x1xf32>, vector<64x1xf32> -> vector<64x1xf32>
      %47 = vector.broadcast %46 : vector<64x1xf32> to vector<64x256xf32>
      %48 = arith.subf %38, %47 : vector<64x256xf32>
      %49 = arith.mulf %48, %48 : vector<64x256xf32>
      %cst_28 = arith.constant dense<0.000000e+00> : vector<64xf32>
      %50 = vector.multi_reduction <add>, %49, %cst_28 [1] : vector<64x256xf32> to vector<64xf32>
      %51 = vector.shape_cast %50 : vector<64xf32> to vector<64x1xf32>
      %c0_29 = arith.constant 0 : index
      %c0_30 = arith.constant 0 : index
      %52 = vector.load %arg3[%c0_29, %c0_30] : memref<32x64xf32, #tpu.memory_space<vmem>>, vector<32x64xf32>
      %cst_31 = arith.constant dense<0.000000e+00> : vector<32x1xf32>
      %53 = tpu.matmul %52, %51, %cst_31 {dimension_numbers = #tpu.dot_dimension_numbers<[1], [0], [0], [1], [0, 0, 1, 1], [], []>} : vector<32x64xf32>, vector<64x1xf32>, vector<32x1xf32> -> vector<32x1xf32>
      %cst_32 = arith.constant 5.120000e+02 : f32
      %54 = vector.broadcast %cst_32 : f32 to vector<32x1xf32>
      %55 = arith.divf %53, %54 : vector<32x1xf32>
      %cst_33 = arith.constant 9.99999997E-7 : f32
      %56 = vector.broadcast %cst_33 : f32 to vector<32x1xf32>
      %57 = arith.addf %55, %56 : vector<32x1xf32>
      %58 = math.rsqrt %57 : vector<32x1xf32>
      %c0_34 = arith.constant 0 : index
      %c0_35 = arith.constant 0 : index
      %59 = vector.load %arg4[%c0_34, %c0_35] : memref<64x32xf32, #tpu.memory_space<vmem>>, vector<64x32xf32>
      %cst_36 = arith.constant dense<0.000000e+00> : vector<64x1xf32>
      %60 = tpu.matmul %59, %58, %cst_36 {dimension_numbers = #tpu.dot_dimension_numbers<[1], [0], [0], [1], [0, 0, 1, 1], [], []>} : vector<64x32xf32>, vector<32x1xf32>, vector<64x1xf32> -> vector<64x1xf32>
      %61 = vector.broadcast %60 : vector<64x1xf32> to vector<64x256xf32>
      %62 = arith.mulf %48, %61 : vector<64x256xf32>
      %c0_37 = arith.constant 0 : index
      %c0_38 = arith.constant 0 : index
      %63 = vector.load %arg5[%c0_37, %c0_38] : memref<64x1xf32, #tpu.memory_space<vmem>>, vector<64x1xf32>
      %64 = vector.broadcast %63 : vector<64x1xf32> to vector<64x256xf32>
      %65 = arith.mulf %62, %64 : vector<64x256xf32>
      %c0_39 = arith.constant 0 : index
      %c0_40 = arith.constant 0 : index
      %66 = vector.load %arg6[%c0_39, %c0_40] : memref<64x1xf32, #tpu.memory_space<vmem>>, vector<64x1xf32>
      %67 = vector.broadcast %66 : vector<64x1xf32> to vector<64x256xf32>
      %68 = arith.addf %65, %67 : vector<64x256xf32>
      %c0_41 = arith.constant 0 : index
      %c0_42 = arith.constant 0 : index
      %69 = vector.load %arg7[%c0_41, %c0_42] : memref<192x64xbf16, #tpu.memory_space<vmem>>, vector<192x64xbf16>
      %70 = arith.truncf %68 : vector<64x256xf32> to vector<64x256xbf16>
      %cst_43 = arith.constant dense<0.000000e+00> : vector<192x256xf32>
      %71 = tpu.matmul %69, %70, %cst_43 {dimension_numbers = #tpu.dot_dimension_numbers<[1], [0], [0], [1], [0, 0, 1, 1], [], []>} : vector<192x64xbf16>, vector<64x256xbf16>, vector<192x256xf32> -> vector<192x256xf32>
      %c0_44 = arith.constant 0 : index
      %c0_45 = arith.constant 0 : index
      %72 = vector.load %arg8[%c0_44, %c0_45] : memref<192x1xf32, #tpu.memory_space<vmem>>, vector<192x1xf32>
      %73 = vector.broadcast %72 : vector<192x1xf32> to vector<192x256xf32>
      %74 = arith.addf %71, %73 : vector<192x256xf32>
      %75 = arith.truncf %74 : vector<192x256xf32> to vector<192x256xbf16>
      %c0_46 = arith.constant 0 : index
      %c0_47 = arith.constant 0 : index
      %76 = vector.load %arg12[%c0_46, %c0_47] : memref<192x256xbf16, #tpu.memory_space<vmem>>, vector<192x256xbf16>
      tpu.vector_store %arg12[%c0_46, %c0_47], %75 {strides = array<i32>} : memref<192x256xbf16, #tpu.memory_space<vmem>>, vector<192x256xbf16>,
    } else {
    }
    %c256_i32 = arith.constant 256 : i32
    %3 = arith.muli %arg1, %c256_i32 : i32
    %4 = tpu.assume_multiple %3, 256 : i32
    %c0 = arith.constant 0 : index
    %5 = arith.index_cast %4 : i32 to index
    %6 = vector.load %arg12[%c0, %5] : memref<192x256xbf16, #tpu.memory_space<vmem>>, vector<64x256xbf16>
    %c64 = arith.constant 64 : index
    %c0_1 = arith.constant 0 : index
    %7 = vector.load %arg12[%c64, %c0_1] : memref<192x256xbf16, #tpu.memory_space<vmem>>, vector<64x256xbf16>
    %c128 = arith.constant 128 : index
    %c0_2 = arith.constant 0 : index
    %8 = vector.load %arg12[%c128, %c0_2] : memref<192x256xbf16, #tpu.memory_space<vmem>>, vector<64x256xbf16>
    %cst = arith.constant dense<0.000000e+00> : vector<256x256xf32>
    %9 = tpu.matmul %6, %7, %cst {dimension_numbers = #tpu.dot_dimension_numbers<[0], [0], [1], [1], [0, 1, 1, 1], [], []>} : vector<64x256xbf16>, vector<64x256xbf16>, vector<256x256xf32> -> vector<256x256xf32>
    %cst_3 = arith.constant 1.250000e-01 : f32
    %10 = vector.broadcast %cst_3 : f32 to vector<256x256xf32>
    %11 = arith.mulf %9, %10 : vector<256x256xf32>
    %cst_4 = arith.constant dense<0xFF800000> : vector<256xf32>
    %12 = vector.multi_reduction <maximumf>, %11, %cst_4 [1] : vector<256x256xf32> to vector<256xf32>
    %13 = vector.shape_cast %12 : vector<256xf32> to vector<256x1xf32>
    %14 = vector.broadcast %13 : vector<256x1xf32> to vector<256x256xf32>
    %15 = arith.subf %11, %14 : vector<256x256xf32>
    %16 = math.exp %15 : vector<256x256xf32>
    %cst_5 = arith.constant dense<0.000000e+00> : vector<256xf32>
    %17 = vector.multi_reduction <add>, %16, %cst_5 [1] : vector<256x256xf32> to vector<256xf32>
    %18 = vector.shape_cast %17 : vector<256xf32> to vector<256x1xf32>
    %19 = tpu.reciprocal %18 {approx = true} : vector<256x1xf32> -> vector<256x1xf32>
    %20 = vector.broadcast %19 : vector<256x1xf32> to vector<256x256xf32>
    %21 = arith.mulf %16, %20 : vector<256x256xf32>
    %22 = arith.truncf %21 : vector<256x256xf32> to vector<256x256xbf16>
    %cst_6 = arith.constant dense<0.000000e+00> : vector<64x256xf32>
    %23 = tpu.matmul %8, %22, %cst_6 {dimension_numbers = #tpu.dot_dimension_numbers<[1], [1], [0], [0], [0, 0, 1, 0], [], []>} : vector<64x256xbf16>, vector<256x256xbf16>, vector<64x256xf32> -> vector<64x256xf32>
    %c0_7 = arith.constant 0 : index
    %c0_8 = arith.constant 0 : index
    %24 = vector.load %arg9[%c0_7, %c0_8] : memref<64x64xbf16, #tpu.memory_space<vmem>>, vector<64x64xbf16>
    %25 = arith.truncf %23 : vector<64x256xf32> to vector<64x256xbf16>
    %cst_9 = arith.constant dense<0.000000e+00> : vector<64x256xf32>
    %26 = tpu.matmul %24, %25, %cst_9 {dimension_numbers = #tpu.dot_dimension_numbers<[1], [0], [0], [1], [0, 0, 1, 1], [], []>} : vector<64x64xbf16>, vector<64x256xbf16>, vector<64x256xf32> -> vector<64x256xf32>
    %c0_10 = arith.constant 0 : index
    %c0_11 = arith.constant 0 : index
    %27 = vector.load %arg10[%c0_10, %c0_11] : memref<64x1xf32, #tpu.memory_space<vmem>>, vector<64x1xf32>
    %28 = vector.broadcast %27 : vector<64x1xf32> to vector<64x256xf32>
    %29 = arith.addf %26, %28 : vector<64x256xf32>
    %c0_12 = arith.constant 0 : index
    %c0_13 = arith.constant 0 : index
    %30 = arith.index_cast %4 : i32 to index
    %31 = vector.load %arg2[%c0_12, %c0_13, %30] : memref<1x64x256xf32, #tpu.memory_space<vmem>>, vector<1x64x256xf32>
    %32 = vector.shape_cast %31 : vector<1x64x256xf32> to vector<64x256xf32>
    %33 = arith.addf %32, %29 : vector<64x256xf32>
    %c0_14 = arith.constant 0 : index
    %c0_15 = arith.constant 0 : index
    %c0_16 = arith.constant 0 : index
    %34 = vector.load %arg11[%c0_14, %c0_15, %c0_16] : memref<1x64x256xf32, #tpu.memory_space<vmem>>, vector<1x64x256xf32>
    %35 = vector.shape_cast %34 : vector<1x64x256xf32> to vector<64x256xf32>
    %36 = vector.shape_cast %33 : vector<64x256xf32> to vector<1x64x256xf32>
    tpu.vector_store %arg11[%c0_14, %c0_15, %c0_16], %36 {strides = array<i32>} : memref<1x64x256xf32, #tpu.memory_space<vmem>>, vector<1x64x256xf32>,
    return
  }
  func.func @transform_0(%arg0: i32, %arg1: i32) -> (i32, i32, i32) {
    %c0_i32 = arith.constant 0 : i32
    %c0_i32_0 = arith.constant 0 : i32
    %c0_i32_1 = arith.constant 0 : i32
    return %arg0, %c0_i32, %c0_i32_0 : i32, i32, i32
  }
  func.func @transform_1(%arg0: i32, %arg1: i32) -> (i32, i32) {
    %c0_i32 = arith.constant 0 : i32
    %c0_i32_0 = arith.constant 0 : i32
    %c0_i32_1 = arith.constant 0 : i32
    return %c0_i32, %c0_i32_0 : i32, i32
  }
  func.func @transform_2(%arg0: i32, %arg1: i32) -> (i32, i32) {
    %c0_i32 = arith.constant 0 : i32
    %c0_i32_0 = arith.constant 0 : i32
    %c0_i32_1 = arith.constant 0 : i32
    return %c0_i32, %c0_i32_0 : i32, i32
  }
  func.func @transform_3(%arg0: i32, %arg1: i32) -> (i32, i32) {
    %c0_i32 = arith.constant 0 : i32
    %c0_i32_0 = arith.constant 0 : i32
    %c0_i32_1 = arith.constant 0 : i32
    return %c0_i32, %c0_i32_0 : i32, i32
  }
  func.func @transform_4(%arg0: i32, %arg1: i32) -> (i32, i32) {
    %c0_i32 = arith.constant 0 : i32
    %c0_i32_0 = arith.constant 0 : i32
    %c0_i32_1 = arith.constant 0 : i32
    return %c0_i32, %c0_i32_0 : i32, i32
  }
  func.func @transform_5(%arg0: i32, %arg1: i32) -> (i32, i32) {
    %c0_i32 = arith.constant 0 : i32
    %c0_i32_0 = arith.constant 0 : i32
    %c0_i32_1 = arith.constant 0 : i32
    return %c0_i32, %c0_i32_0 : i32, i32
  }
  func.func @transform_6(%arg0: i32, %arg1: i32) -> (i32, i32) {
    %c0_i32 = arith.constant 0 : i32
    %c0_i32_0 = arith.constant 0 : i32
    %c0_i32_1 = arith.constant 0 : i32
    return %c0_i32, %c0_i32_0 : i32, i32
  }
  func.func @transform_7(%arg0: i32, %arg1: i32) -> (i32, i32) {
    %c0_i32 = arith.constant 0 : i32
    %c0_i32_0 = arith.constant 0 : i32
    %c0_i32_1 = arith.constant 0 : i32
    return %c0_i32, %c0_i32_0 : i32, i32
  }
  func.func @transform_8(%arg0: i32, %arg1: i32) -> (i32, i32) {
    %c0_i32 = arith.constant 0 : i32
    %c0_i32_0 = arith.constant 0 : i32
    %c0_i32_1 = arith.constant 0 : i32
    return %c0_i32, %c0_i32_0 : i32, i32
  }
  func.func @transform_9(%arg0: i32, %arg1: i32) -> (i32, i32, i32) {
    %c0_i32 = arith.constant 0 : i32
    %c0_i32_0 = arith.constant 0 : i32
    return %arg0, %c0_i32, %arg1 : i32, i32, i32
  }
}

</mosaic_0001>

<bundles_post_ra>
// kernel: tpu_custom_call.1
= control target key start
LH: loop header
LB: loop body
LE: loop exit
PB: predicated region body
PF: predicated region fallthrough
CT: control target
= control target key end

     0   :  { %14 = vsyncpa [#allocation4], 0  ;;  %s5097_s0 = inlined_call_operand.vmem [shape: f32[2,64,256], index: 0, kind: input, shape index: {}]   ;;  %s5098_s1 = inlined_call_operand.vmem [shape: f32[32,64], index: 1, kind: input, shape index: {}]   ;;  %s5099_s2 = inlined_call_operand.vmem [shape: f32[64,32], index: 2, kind: input, shape index: {}]   ;;  %s5100_s3 = inlined_call_operand.vmem [shape: f32[64,1], index: 3, kind: input, shape index: {}]   ;;  %s5101_s4 = inlined_call_operand.vmem [shape: f32[64,1], index: 4, kind: input, shape index: {}]   ;;  %s5102_s5 = inlined_call_operand.vmem [shape: bf16[192,64], index: 5, kind: input, shape index: {}]   ;;  %s5103_s6 = inlined_call_operand.vmem [shape: f32[192,1], index: 6, kind: input, shape index: {}]   ;;  %s5104_s7 = inlined_call_operand.vmem [shape: bf16[64,64], index: 7, kind: input, shape index: {}]   ;;  %s5105_s8 = inlined_call_operand.vmem [shape: f32[64,1], index: 8, kind: input, shape index: {}]   ;;  %s5106_s9 = inlined_call_operand.hbm [shape: f32[2,64,256], index: 9, kind: output, shape index: {}]  }
   0x1   :  { %16 = vsyncpa [#allocation4 + $0x1], 0  ;;  %s3818_s30 = smov 0   ;;  %s3820_s10 = smov 0  }
   0x2   :  { %s3822_s11 = smov 0   ;;  %s3824_s12 = smov 0  }
   0x3   :  { %s3826_s13 = smov 0   ;;  %s3828_s14 = smov 0  }
   0x4 LB: > { %s3095_s15 = sadd.s32 4294967295, %s3762_s14   ;;  %s3096_s16 = sadd.s32 4294967294, %s3762_s14   ;;  %s3762_s14 = sphi %s3828_s14, %s22_s14   ;;  %s3758_s13 = sphi %s3826_s13, %s5200_s13   ;;  %s3754_s12 = sphi %s3824_s12, %s5199_s12   ;;  %s3750_s11 = sphi %s3822_s11, %s5198_s11   ;;  %s3746_s10 = sphi %s3820_s10, %s5197_s10   ;;  %s3742_s30 = sphi %s3818_s30, %s5196_s30  }
   0x5   : > { %s34_s17 = sadd.s32 1, %s3758_s13  ;;  %s237_s18 = sadd.s32 1, %s3750_s11 }
   0x6   : > { %p36_p0 = scmp.ge.s32.totalorder %s34_s17, 2  ;;  %p247_p1 = scmp.ne.s32.totalorder %s3750_s11, %s3746_s10 }
   0x7   : > { %p248_p2 = scmp.eq.s32.totalorder %s3095_s15, 1  ;;  %p253_p3 = scmp.ne.s32.totalorder %s3746_s10, %s3742_s30 }
   0x8   : > { %s5202_s17 = smov (%p36_p0, %s34_s17), 0  ;;  %p254_p5 = scmp.eq.s32.totalorder %s3096_s16, 1 }
   0x9   : > { %p3858_p4 = por %p248_p2, %p247_p1  ;;  %s232_s20 = ssub.s32 %s3758_s13, %s5202_s17 }
   0xa   : > { %p3099_p6 = scmp.ge.s32.totalorder %s3762_s14, 1  ;;  %p235_p7 = scmp.eq.s32.totalorder %s232_s20, 0 }
   0xb   : > { %p3865_p8 = por %p254_p5, %p253_p3  ;;  %p304_p9 = scmp.lt.s32.totalorder %s3762_s14, 3 }
   0xc   : > { %s3871_s22 = scalar_select %p235_p7, %s3750_s11, %s237_s18  }
   0xd   : > { %p305_p10 = pnand %p3099_p6, %p304_p9 }
   0xf   : > { %308 = sbr.rel (%p305_p10) target bundleno = 3032 (0xbd8), region = 56 }
  0x14   : > { %p340_p11 = scmp.lt.s32.totalorder %s3754_s12, 1  ;;  %v3947_v24 = vld [vmem:[%s5098_s1] sm:$0xff]  ;;  %vm395_vm0 = vcmask 523264   ;;  %v3954_v33 = vld [vmem:[%s5098_s1 + $0x8] sm:$0xff]  ;;  %v3959_v34 = vld [vmem:[%s5098_s1 + $0x10] sm:$0xff]  ;;  %vm506_vm1 = vcmask 261120  }
  0x15   : > { %3342 = vmatprep.mubr.msk.f32.mxu0 %vm395_vm0, %v3947_v24  ;;  %v3968_v35 = vld [vmem:[%s5098_s1 + $0x18] sm:$0xff]  ;;  %v498_v36 = vld [vmem:[%s5099_s2] sm:$0xff]  ;;  %v3980_v45 = vld [vmem:[%s5099_s2 + $0x8] sm:$0xff]  ;;  %v5107_v52 = vmov 0   ;;  %s337_s15 = sand.u32 1, %s3746_s10   ;;  %s3253_s20 = sshll.u32 %s3754_s12, 11 }
  0x16   : > { %s341_s23 = scalar_select %p340_p11, %s3754_s12, 1  ;;  %3356 = vmatprep.mubr.msk.f32.mxu1 %vm506_vm1, %v498_v36  ;;  %v3985_v46 = vld [vmem:[%s5099_s2 + $0x10] sm:$0xff]  ;;  %v3994_v47 = vld [vmem:[%s5099_s2 + $0x18] sm:$0xff]  ;;  %v3999_v48 = vld [vmem:[%s5099_s2 + $0x20] sm:$0xff]  ;;  %3469 = vset.pattern.permute.xlu1 %v5107_v52 }
  0x17   : > { %v4008_v49 = vld [vmem:[%s5099_s2 + $0x28] sm:$0xff]  ;;  %v4013_v50 = vld [vmem:[%s5099_s2 + $0x30] sm:$0xff]  ;;  %v4022_v51 = vld [vmem:[%s5099_s2 + $0x38] sm:$0xff]  ;;  %3468 = vset.pattern.permute.xlu0 %v5107_v52  ;;  %s3100_s16 = sshll.u32 %s337_s15, 7  ;;  %s5044_s26 = scalar_lea.hbm %s5106_s9, %s3253_s20 }
  0x18   : > { %s3228_s24 = sshll.u32 %s341_s23, 7  ;;  %s5010_s18 = scalar_lea.vmem [#allocation3], %s3100_s16 }
  0x19   : > { %s3878_s27 = scalar_lea.vmem %s5097_s0, %s3228_s24  ;;  %s3018_s23 = sshll.u32 %s5010_s18, 4  ;;  %s5046_s23 = int_to_ptr.vmem [resolvable:$true] %s3018_s23 }
  0x1a   : > { %v3881_v0 = vld [vmem:[%s3878_s27 + $0x70] sm:$0xff]  ;;  %v3884_v1 = vld [vmem:[%s3878_s27 + $0x78] sm:$0xff]  ;;  %v3887_v2 = vld [vmem:[%s3878_s27 + $0x60] sm:$0xff]  ;;  %s5052_s12 = scalar_lea.sflag [#allocation4], %s337_s15  ;;  %s3765_s28 = smov [#allocation3]  }
  0x1b   : > { %v388_v3 = vadd.f32 %v3884_v1, %v3881_v0  ;;  %v3892_v4 = vld [vmem:[%s3878_s27 + $0x68] sm:$0xff]  ;;  %v3895_v5 = vld [vmem:[%s3878_s27 + $0x50] sm:$0xff]  ;;  %v3898_v6 = vld [vmem:[%s3878_s27 + $0x58] sm:$0xff]  ;;  %s3690_s29 = sshll.u32 %s3765_s28, 4  ;;  %s3691_s29 = int_to_ptr.vmem [resolvable:$false] %s3690_s29 }
  0x1c   : > { %v382_v7 = vadd.f32 %v3898_v6, %v3895_v5  ;;  %v3903_v8 = vld [vmem:[%s3878_s27 + $0x40] sm:$0xff]  ;;  %v3906_v9 = vld [vmem:[%s3878_s27 + $0x48] sm:$0xff]  ;;  %v385_v10 = vadd.f32 %v3892_v4, %v3887_v2  ;;  %v3913_v12 = vld [vmem:[%s3878_s27 + $0x30] sm:$0xff]  ;;  %s3692_s16 = scalar_lea.vmem %s3691_s29, 4096  ;;  %p3693_p1 = scmp.lt.s32.totalorder %s5046_s23, %s3691_s29 }
  0x1d   : > { %389 = vadd.xlane.f32.xlu0 %v388_v3  ;;  %v379_v11 = vadd.f32 %v3906_v9, %v3903_v8  ;;  %v3916_v13 = vld [vmem:[%s3878_s27 + $0x38] sm:$0xff]  ;;  %v3919_v14 = vld [vmem:[%s3878_s27 + $0x20] sm:$0xff]  ;;  %v3922_v15 = vld [vmem:[%s3878_s27 + $0x28] sm:$0xff] }
  0x1e   : > { %383 = vadd.xlane.f32.xlu1 %v382_v7  ;;  %v3925_v16 = vld [vmem:[%s3878_s27 + $0x10] sm:$0xff]  ;;  %v3928_v17 = vld [vmem:[%s3878_s27 + $0x18] sm:$0xff]  ;;  %v376_v18 = vadd.f32 %v3916_v13, %v3913_v12  ;;  %v3933_v19 = vld [vmem:[%s3878_s27] sm:$0xff]  ;;  %v373_v21 = vadd.f32 %v3922_v15, %v3919_v14 }
  0x1f   : > { %v3936_v20 = vld [vmem:[%s3878_s27 + $0x8] sm:$0xff]  ;;  %v370_v22 = vadd.f32 %v3928_v17, %v3925_v16 }
  0x20   : > { %v367_v23 = vadd.f32 %v3936_v20, %v3933_v19 }
  0x21   : > { %386 = vadd.xlane.f32.xlu0 %v385_v10 }
  0x22   : > { %380 = vadd.xlane.f32.xlu1 %v379_v11 }
  0x25   : > { %377 = vadd.xlane.f32.xlu0 %v376_v18 }
  0x26   : > { %374 = vadd.xlane.f32.xlu1 %v373_v21 }
  0x29   : > { %371 = vadd.xlane.f32.xlu0 %v370_v22 }
  0x2a   : > { %368 = vadd.xlane.f32.xlu1 %v367_v23 }
  0xa6   : > { %v390_v25 = vpop.xlane.xlu0 %389 }
  0xa7   : > { %3326 = vmatprep.subr.mxu0 %v390_v25  ;;  %v384_v26 = vpop.xlane.xlu1 %383 }
  0xa8   : > { %3327 = vmatpush3.msra.mxu0 %v390_v25 }
  0xaa   : > { %v387_v27 = vpop.xlane.xlu0 %386 }
  0xab   : > { %3328 = vmatprep.subr.mxu0 %v387_v27  ;;  %v381_v28 = vpop.xlane.xlu1 %380 }
  0xac   : > { %3329 = vmatpush3.msra.mxu0 %v387_v27 }
  0xad   : > { %3330 = vmatprep.subr.mxu0 %v384_v26 }
  0xae   : > { %3331 = vmatpush3.msra.mxu0 %v384_v26  ;;  %v378_v29 = vpop.xlane.xlu0 %377 }
  0xaf   : > { %3332 = vmatprep.subr.mxu0 %v381_v28  ;;  %v375_v30 = vpop.xlane.xlu1 %374 }
  0xb0   : > { %3333 = vmatpush3.msra.mxu0 %v381_v28 }
  0xb1   : > { %3334 = vmatprep.subr.mxu0 %v378_v29 }
  0xb2   : > { %3335 = vmatpush3.msra.mxu0 %v378_v29  ;;  %v372_v31 = vpop.xlane.xlu0 %371 }
  0xb3   : > { %3336 = vmatprep.subr.mxu0 %v375_v30  ;;  %v369_v32 = vpop.xlane.xlu1 %368 }
  0xb4   : > { %3337 = vmatpush3.msra.mxu0 %v375_v30 }
  0xb5   : > { %3338 = vmatprep.subr.mxu0 %v372_v31 }
  0xb6   : > { %3339 = vmatpush3.msra.mxu0 %v372_v31 }
  0xb7   : > { %3340 = vmatprep.subr.mxu0 %v369_v32 }
  0xb8   : > { %3341 = vmatpush3.msra.mxu0 %v369_v32 }
  0xb9   : > { %3343 = vmatmul.mubr.msk.f32.vlgmr.msra.gmra.mxu0 %vm395_vm0, %v3954_v33 }
  0xba   : > { %3345 = vmatprep.mubr.msk.f32.mxu0 %vm395_vm0, %v3959_v34 }
  0xbd   : > { %3346 = vmatmul.mubr.msk.f32.gmra.mxu0 %vm395_vm0, %v3968_v35 }
  0xbe   : > { %3398 = vmatprep.mubr.msk.f32.mxu0 %vm506_vm1, %v498_v36 }
 0x179   : > { %v3344_v37 = vpop.f32.mrf.mxu0 }
 0x17a   : > { %v495_v43 = vmul.f32 0.001953125, %v3344_v37 }
 0x17b   : > { %v474_v38 = vpop.f32.mrf.mxu0 }
 0x17c   : > { %v494_v44 = vmul.f32 0.001953125, %v474_v38 }
 0x17d   : > { %v3347_v39 = vpop.f32.mrf.mxu0 }
 0x17e   : > { %v497_v40 = vmul.f32 0.001953125, %v3347_v39 }
 0x17f   : > { %v484_v41 = vpop.f32.mrf.mxu0 }
 0x180   : > { %v496_v42 = vmul.f32 0.001953125, %v484_v41  ;;  %3348 = vmatprep.subr.mxu1 %v497_v40 }
 0x181   : > { %3349 = vmatpush3.msra.mxu1 %v497_v40 }
 0x182   : > { %3350 = vmatprep.subr.mxu1 %v496_v42 }
 0x183   : > { %3351 = vmatpush3.msra.mxu1 %v496_v42 }
 0x184   : > { %3352 = vmatprep.subr.mxu1 %v495_v43 }
 0x185   : > { %3353 = vmatpush3.msra.mxu1 %v495_v43 }
 0x186   : > { %3354 = vmatprep.subr.mxu1 %v494_v44 }
 0x187   : > { %3355 = vmatpush3.msra.mxu1 %v494_v44 }
 0x188   : > { %3357 = vmatmul.mubr.msk.f32.vlgmr.msra.gmra.mxu1 %vm506_vm1, %v3980_v45 }
 0x189   : > { %3359 = vmatprep.mubr.msk.f32.mxu1 %vm506_vm1, %v3985_v46 }
 0x18c   : > { %3360 = vmatmul.mubr.msk.f32.gmra.mxu1 %vm506_vm1, %v3994_v47 }
 0x18d   : > { %3362 = vmatprep.mubr.msk.f32.mxu1 %vm506_vm1, %v3999_v48 }
 0x190   : > { %3363 = vmatmul.mubr.msk.f32.gmra.mxu1 %vm506_vm1, %v4008_v49 }
 0x191   : > { %3365 = vmatprep.mubr.msk.f32.mxu1 %vm506_vm1, %v4013_v50 }
 0x194   : > { %3366 = vmatmul.mubr.msk.f32.gmra.mxu1 %vm506_vm1, %v4022_v51 }
 0x195   : > { %3384 = vmatprep.mubr.msk.f32.mxu1 %vm395_vm0, %v3947_v24 }
 0x248   : > { %v3358_v53 = vpop.f32.mrf.mxu1 }
 0x24a   : > { %v597_v54 = vpop.f32.mrf.mxu1 }
 0x24c   : > { %v3361_v55 = vpop.f32.mrf.mxu1 }
 0x24e   : > { %v607_v56 = vpop.f32.mrf.mxu1 }
 0x250   : > { %v3364_v57 = vpop.f32.mrf.mxu1 }
 0x251   : > { %663 = vperm.xlu1 %3469, %v3364_v57  }
 0x252   : > { %v617_v58 = vpop.f32.mrf.mxu1 }
 0x254   : > { %v3367_v59 = vpop.f32.mrf.mxu1 }
 0x255   : > { %658 = vperm.xlu1 %3469, %v617_v58   ;;  %673 = vperm.xlu0 %3468, %v3367_v59   ;;  %v997_v58 = vld [vmem:[%s5100_s3 + $0x38] sm:$0xff]  ;;  %v994_v59 = vld [vmem:[%s5100_s3 + $0x20] sm:$0xff] }
 0x256   : > { %v627_v60 = vpop.f32.mrf.mxu1 }
 0x259   : > { %653 = vperm.xlu1 %3469, %v3361_v55  }
 0x25d   : > { %668 = vperm.xlu1 %3469, %v627_v60   ;;  %v1061_v60 = vld [vmem:[%s5101_s4 + $0x38] sm:$0xff] }
 0x261   : > { %648 = vperm.xlu1 %3469, %v607_v56  }
 0x265   : > { %643 = vperm.xlu1 %3469, %v3358_v53  }
 0x269   : > { %638 = vperm.xlu1 %3469, %v597_v54  }
 0x2cc   : > { %v664_v61 = vpop.permute.xlu1 %663 }
 0x2cd   : > { %v4054_v24 = vsub.f32 %v3898_v6, %v664_v61 }
 0x2cf   : > { %v703_v36 = vmul.f32 %v4054_v24, %v4054_v24 }
 0x2d0   : > { %v659_v62 = vpop.permute.xlu1 %658  ;;  %v674_v63 = vpop.permute.xlu0 %673 }
 0x2d1   : > { %v4031_v3 = vsub.f32 %v3903_v8, %v659_v62  ;;  %v4034_v7 = vsub.f32 %v3906_v9, %v659_v62  ;;  %v4037_v10 = vsub.f32 %v3881_v0, %v674_v63  ;;  %v4040_v11 = vsub.f32 %v3884_v1, %v674_v63  ;;  %v995_v62 = vld [vmem:[%s5100_s3 + $0x28] sm:$0xff]  ;;  %v992_v63 = vld [vmem:[%s5100_s3 + $0x10] sm:$0xff] }
 0x2d2   : > { %v4051_v0 = vsub.f32 %v3895_v5, %v664_v61  ;;  %v1058_v61 = vld [vmem:[%s5101_s4 + $0x20] sm:$0xff] }
 0x2d3   : > { %v706_v18 = vmul.f32 %v4037_v10, %v4037_v10  ;;  %v707_v21 = vmul.f32 %v4040_v11, %v4040_v11  ;;  %v700_v8 = vmul.f32 %v4031_v3, %v4031_v3  ;;  %v701_v9 = vmul.f32 %v4034_v7, %v4034_v7 }
 0x2d4   : > { %v654_v22 = vpop.permute.xlu1 %653 }
 0x2d5   : > { %v729_v23 = vadd.f32 %v707_v21, %v706_v18  ;;  %v720_v27 = vadd.f32 %v701_v9, %v700_v8  ;;  %v4067_v5 = vsub.f32 %v3913_v12, %v654_v22  ;;  %v4070_v6 = vsub.f32 %v3916_v13, %v654_v22  ;;  %v1059_v18 = vld [vmem:[%s5101_s4 + $0x28] sm:$0xff]  ;;  %v993_v21 = vld [vmem:[%s5100_s3 + $0x18] sm:$0xff] }
 0x2d7   : > { %730 = vadd.xlane.f32.xlu1 %v729_v23  ;;  %v698_v38 = vmul.f32 %v4067_v5, %v4067_v5 }
 0x2d8   : > { %v669_v1 = vpop.permute.xlu1 %668 }
 0x2d9   : > { %v4057_v25 = vsub.f32 %v3887_v2, %v669_v1  ;;  %v4060_v26 = vsub.f32 %v3892_v4, %v669_v1  ;;  %v702_v2 = vmul.f32 %v4051_v0, %v4051_v0 }
 0x2db   : > { %721 = vadd.xlane.f32.xlu1 %v720_v27  ;;  %v704_v28 = vmul.f32 %v4057_v25, %v4057_v25  ;;  %v705_v29 = vmul.f32 %v4060_v26, %v4060_v26  ;;  %v723_v40 = vadd.f32 %v703_v36, %v702_v2 }
 0x2dc   : > { %v649_v30 = vpop.permute.xlu1 %648 }
 0x2dd   : > { %v4075_v4 = vsub.f32 %v3919_v14, %v649_v30  ;;  %v4078_v31 = vsub.f32 %v3922_v15, %v649_v30  ;;  %v726_v32 = vadd.f32 %v705_v29, %v704_v28  ;;  %v699_v14 = vmul.f32 %v4070_v6, %v4070_v6 }
 0x2df   : > { %727 = vadd.xlane.f32.xlu0 %v726_v32  ;;  %v696_v12 = vmul.f32 %v4075_v4, %v4075_v4  ;;  %v697_v13 = vmul.f32 %v4078_v31, %v4078_v31  ;;  %v717_v43 = vadd.f32 %v699_v14, %v698_v38 }
 0x2e0   : > { %v644_v37 = vpop.permute.xlu1 %643 }
 0x2e1   : > { %v4091_v15 = vsub.f32 %v3925_v16, %v644_v37  ;;  %v4094_v39 = vsub.f32 %v3928_v17, %v644_v37  ;;  %v714_v41 = vadd.f32 %v697_v13, %v696_v12 }
 0x2e3   : > { %724 = vadd.xlane.f32.xlu0 %v723_v40  ;;  %715 = vadd.xlane.f32.xlu1 %v714_v41  ;;  %v694_v54 = vmul.f32 %v4091_v15, %v4091_v15  ;;  %v695_v16 = vmul.f32 %v4094_v39, %v4094_v39 }
 0x2e4   : > { %v639_v42 = vpop.permute.xlu1 %638 }
 0x2e5   : > { %v4097_v44 = vsub.f32 %v3933_v19, %v639_v42  ;;  %v4100_v53 = vsub.f32 %v3936_v20, %v639_v42  ;;  %v711_v56 = vadd.f32 %v695_v16, %v694_v54  ;;  %v996_v19 = vld [vmem:[%s5100_s3 + $0x30] sm:$0xff] }
 0x2e6   : > { %v1060_v20 = vld [vmem:[%s5101_s4 + $0x30] sm:$0xff] }
 0x2e7   : > { %718 = vadd.xlane.f32.xlu0 %v717_v43  ;;  %v692_v17 = vmul.f32 %v4097_v44, %v4097_v44  ;;  %v693_v55 = vmul.f32 %v4100_v53, %v4100_v53 }
 0x2e9   : > { %v708_v57 = vadd.f32 %v693_v55, %v692_v17  ;;  %v990_v55 = vld [vmem:[%s5100_s3] sm:$0xff] }
 0x2eb   : > { %712 = vadd.xlane.f32.xlu0 %v711_v56  ;;  %709 = vadd.xlane.f32.xlu1 %v708_v57  ;;  %v991_v56 = vld [vmem:[%s5100_s3 + $0x8] sm:$0xff]  ;;  %v1054_v57 = vld [vmem:[%s5101_s4] sm:$0xff] }
 0x2fc   : > { %1030 = vperm.xlu1 %3469, %v996_v19   ;;  %v1055_v19 = vld [vmem:[%s5101_s4 + $0x8] sm:$0xff] }
 0x300   : > { %1094 = vperm.xlu1 %3469, %v1060_v20   ;;  %v1150_v20 = vld [vmem:[%s5103_s6] sm:$0xff] }
 0x301   : > { %1035 = vperm.xlu0 %3468, %v997_v58   ;;  %v1151_v58 = vld [vmem:[%s5103_s6 + $0x8] sm:$0xff] }
 0x304   : > { %1020 = vperm.xlu1 %3469, %v994_v59   ;;  %v1152_v59 = vld [vmem:[%s5103_s6 + $0x10] sm:$0xff] }
 0x305   : > { %1099 = vperm.xlu0 %3468, %v1061_v60   ;;  %v1153_v60 = vld [vmem:[%s5103_s6 + $0x18] sm:$0xff] }
 0x308   : > { %1084 = vperm.xlu1 %3469, %v1058_v61   ;;  %v1154_v61 = vld [vmem:[%s5103_s6 + $0x20] sm:$0xff] }
 0x309   : > { %1025 = vperm.xlu0 %3468, %v995_v62   ;;  %v1155_v62 = vld [vmem:[%s5103_s6 + $0x28] sm:$0xff] }
 0x30c   : > { %1010 = vperm.xlu1 %3469, %v992_v63   ;;  %v1156_v63 = vld [vmem:[%s5103_s6 + $0x30] sm:$0xff] }
 0x30d   : > { %1089 = vperm.xlu0 %3468, %v1059_v18   ;;  %v1157_v18 = vld [vmem:[%s5103_s6 + $0x38] sm:$0xff] }
 0x311   : > { %1015 = vperm.xlu0 %3468, %v993_v21   ;;  %v1164_v21 = vld [vmem:[%s5103_s6 + $0x70] sm:$0xff] }
 0x360   : > { %v731_v22 = vpop.xlane.xlu1 %730 }
 0x361   : > { %3368 = vmatprep.subr.mxu1 %v731_v22 }
 0x362   : > { %3369 = vmatpush3.msra.mxu1 %v731_v22  ;;  %v1165_v22 = vld [vmem:[%s5103_s6 + $0x78] sm:$0xff] }
 0x364   : > { %v722_v9 = vpop.xlane.xlu1 %721 }
 0x368   : > { %v728_v23 = vpop.xlane.xlu0 %727 }
 0x369   : > { %3370 = vmatprep.subr.mxu1 %v728_v23 }
 0x36a   : > { %3371 = vmatpush3.msra.mxu1 %v728_v23  ;;  %v1162_v23 = vld [vmem:[%s5103_s6 + $0x60] sm:$0xff] }
 0x36c   : > { %v725_v8 = vpop.xlane.xlu0 %724  ;;  %v716_v27 = vpop.xlane.xlu1 %715 }
 0x36d   : > { %3372 = vmatprep.subr.mxu1 %v725_v8 }
 0x36e   : > { %3373 = vmatpush3.msra.mxu1 %v725_v8  ;;  %v1163_v8 = vld [vmem:[%s5103_s6 + $0x68] sm:$0xff] }
 0x36f   : > { %3374 = vmatprep.subr.mxu1 %v722_v9 }
 0x370   : > { %v719_v1 = vpop.xlane.xlu0 %718  ;;  %3375 = vmatpush3.msra.mxu1 %v722_v9  ;;  %v1160_v9 = vld [vmem:[%s5103_s6 + $0x50] sm:$0xff] }
 0x371   : > { %3376 = vmatprep.subr.mxu1 %v719_v1 }
 0x372   : > { %3377 = vmatpush3.msra.mxu1 %v719_v1  ;;  %v1161_v1 = vld [vmem:[%s5103_s6 + $0x58] sm:$0xff] }
 0x373   : > { %3378 = vmatprep.subr.mxu1 %v716_v27 }
 0x374   : > { %v713_v28 = vpop.xlane.xlu0 %712  ;;  %3379 = vmatpush3.msra.mxu1 %v716_v27  ;;  %v710_v29 = vpop.xlane.xlu1 %709  ;;  %v1158_v27 = vld [vmem:[%s5103_s6 + $0x40] sm:$0xff] }
 0x375   : > { %3380 = vmatprep.subr.mxu1 %v713_v28 }
 0x376   : > { %3381 = vmatpush3.msra.mxu1 %v713_v28  ;;  %v1159_v28 = vld [vmem:[%s5103_s6 + $0x48] sm:$0xff] }
 0x377   : > { %3382 = vmatprep.subr.mxu1 %v710_v29 }
 0x378   : > { %3383 = vmatpush3.msra.mxu1 %v710_v29 }
 0x379   : > { %3385 = vmatmul.mubr.msk.f32.vlgmr.msra.gmra.mxu1 %vm395_vm0, %v3954_v33 }
 0x37a   : > { %3387 = vmatprep.mubr.msk.f32.mxu1 %vm395_vm0, %v3959_v34 }
 0x37c   : > { %v1036_v29 = vpop.permute.xlu0 %1035 }
 0x37d   : > { %3388 = vmatmul.mubr.msk.f32.gmra.mxu1 %vm395_vm0, %v3968_v35 }
 0x37e   : > { %1933 = vmatprep.mubr.bf16.mxu1 %v5107_v52 }
 0x439   : > { %v3386_v30 = vpop.f32.mrf.mxu1 }
 0x43a   : > { %v818_v36 = vmul.f32 0.001953125, %v3386_v30  ;;  %v1031_v30 = vpop.permute.xlu1 %1030 }
 0x43b   : > { %v798_v2 = vpop.f32.mrf.mxu1 }
 0x43c   : > { %v817_v37 = vmul.f32 0.001953125, %v798_v2  ;;  %v822_v40 = vadd.f32 1e-06, %v818_v36  ;;  %v1100_v2 = vpop.permute.xlu0 %1099 }
 0x43d   : > { %v3389_v32 = vpop.f32.mrf.mxu1 }
 0x43e   : > { %v820_v12 = vmul.f32 0.001953125, %v3389_v32  ;;  %v821_v41 = vadd.f32 1e-06, %v817_v37  ;;  %v1095_v32 = vpop.permute.xlu1 %1094 }
 0x43f   : > { %v808_v13 = vpop.f32.mrf.mxu1 }
 0x440   : > { %v824_v38 = vadd.f32 1e-06, %v820_v12  ;;  %v819_v14 = vmul.f32 0.001953125, %v808_v13  ;;  %v1026_v36 = vpop.permute.xlu0 %1025 }
 0x442   : > { %3486 = vrsqrt.f32 %v824_v38  ;;  %v823_v33 = vadd.f32 1e-06, %v819_v14  ;;  %v1021_v12 = vpop.permute.xlu1 %1020 }
 0x444   : > { %3488 = vrsqrt.f32 %v823_v33  ;;  %v1090_v13 = vpop.permute.xlu0 %1089 }
 0x445   : > { %3490 = vrsqrt.f32 %v822_v40 }
 0x446   : > { %3492 = vrsqrt.f32 %v821_v41  ;;  %v1085_v37 = vpop.permute.xlu1 %1084 }
 0x448   : > { %v1016_v38 = vpop.permute.xlu0 %1015 }
 0x44a   : > { %v1011_v14 = vpop.permute.xlu1 %1010 }
 0x44f   : > { %v3487_v34 = vpop.eup %3486 }
 0x450   : > { %3390 = vmatprep.subr.mxu0 %v3487_v34 }
 0x451   : > { %v3489_v35 = vpop.eup %3488  ;;  %3391 = vmatpush3.msra.mxu0 %v3487_v34 }
 0x452   : > { %3392 = vmatprep.subr.mxu0 %v3489_v35  ;;  %v3491_v42 = vpop.eup %3490 }
 0x453   : > { %3393 = vmatpush3.msra.mxu0 %v3489_v35  ;;  %v3493_v43 = vpop.eup %3492 }
 0x454   : > { %3394 = vmatprep.subr.mxu0 %v3491_v42 }
 0x455   : > { %3395 = vmatpush3.msra.mxu0 %v3491_v42 }
 0x456   : > { %3396 = vmatprep.subr.mxu0 %v3493_v43 }
 0x457   : > { %3397 = vmatpush3.msra.mxu0 %v3493_v43 }
 0x458   : > { %3399 = vmatmul.mubr.msk.f32.vlgmr.msra.gmra.mxu0 %vm506_vm1, %v3980_v45 }
 0x459   : > { %3401 = vmatprep.mubr.msk.f32.mxu0 %vm506_vm1, %v3985_v46 }
 0x45c   : > { %3402 = vmatmul.mubr.msk.f32.gmra.mxu0 %vm506_vm1, %v3994_v47 }
 0x45d   : > { %3404 = vmatprep.mubr.msk.f32.mxu0 %vm506_vm1, %v3999_v48 }
 0x460   : > { %3405 = vmatmul.mubr.msk.f32.gmra.mxu0 %vm506_vm1, %v4008_v49 }
 0x461   : > { %3407 = vmatprep.mubr.msk.f32.mxu0 %vm506_vm1, %v4013_v50  ;;  %v1056_v50 = vld [vmem:[%s5101_s4 + $0x10] sm:$0xff] }
 0x464   : > { %3408 = vmatmul.mubr.msk.f32.gmra.mxu0 %vm506_vm1, %v4022_v51  ;;  %v1057_v51 = vld [vmem:[%s5101_s4 + $0x18] sm:$0xff] }
 0x465   : > { %1422 = vmatprep.mubr.bf16.mxu0 %v5107_v52 }
 0x518   : > { %v3400_v45 = vpop.f32.mrf.mxu0 }
 0x51a   : > { %v895_v54 = vpop.f32.mrf.mxu0 }
 0x51c   : > { %v3403_v46 = vpop.f32.mrf.mxu0 }
 0x51d   : > { %951 = vperm.xlu0 %3468, %v3403_v46  }
 0x51e   : > { %v905_v16 = vpop.f32.mrf.mxu0 }
 0x51f   : > { %946 = vperm.xlu1 %3469, %v905_v16  }
 0x520   : > { %v3406_v47 = vpop.f32.mrf.mxu0 }
 0x521   : > { %961 = vperm.xlu0 %3468, %v3406_v47  }
 0x522   : > { %v915_v48 = vpop.f32.mrf.mxu0 }
 0x523   : > { %956 = vperm.xlu1 %3469, %v915_v48  }
 0x524   : > { %v3409_v17 = vpop.f32.mrf.mxu0 }
 0x526   : > { %v925_v49 = vpop.f32.mrf.mxu0 }
 0x527   : > { %971 = vperm.xlu1 %3469, %v3409_v17   ;;  %966 = vperm.xlu0 %3468, %v925_v49  }
 0x52b   : > { %936 = vperm.xlu1 %3469, %v895_v54   ;;  %941 = vperm.xlu0 %3468, %v3400_v45  }
 0x52f   : > { %1074 = vperm.xlu1 %3469, %v1056_v50   ;;  %1079 = vperm.xlu0 %3468, %v1057_v51  }
 0x533   : > { %1000 = vperm.xlu1 %3469, %v990_v55   ;;  %1005 = vperm.xlu0 %3468, %v991_v56  }
 0x537   : > { %1064 = vperm.xlu1 %3469, %v1054_v57   ;;  %1069 = vperm.xlu0 %3468, %v1055_v19  }
 0x53b   : > { %1176 = vperm.xlu1 %3469, %v1150_v20   ;;  %1181 = vperm.xlu0 %3468, %v1151_v58  }
 0x53f   : > { %1186 = vperm.xlu1 %3469, %v1152_v59   ;;  %1191 = vperm.xlu0 %3468, %v1153_v60  }
 0x543   : > { %1196 = vperm.xlu1 %3469, %v1154_v61   ;;  %1201 = vperm.xlu0 %3468, %v1155_v62  }
 0x547   : > { %1206 = vperm.xlu1 %3469, %v1156_v63   ;;  %1211 = vperm.xlu0 %3468, %v1157_v18  }
 0x54b   : > { %1246 = vperm.xlu1 %3469, %v1164_v21   ;;  %1251 = vperm.xlu0 %3468, %v1165_v22  }
 0x54f   : > { %1236 = vperm.xlu1 %3469, %v1162_v23   ;;  %1241 = vperm.xlu0 %3468, %v1163_v8  }
 0x553   : > { %1226 = vperm.xlu1 %3469, %v1160_v9   ;;  %1231 = vperm.xlu0 %3468, %v1161_v1  }
 0x557   : > { %1216 = vperm.xlu1 %3469, %v1158_v27   ;;  %1221 = vperm.xlu0 %3468, %v1159_v28  }
 0x598   : > { %v952_v40 = vpop.permute.xlu0 %951 }
 0x599   : > { %v981_v50 = vmul.f32 %v952_v40, %v4070_v6 }
 0x59a   : > { %v947_v33 = vpop.permute.xlu1 %946 }
 0x59b   : > { %v1045_v60 = vmul.f32 %v1016_v38, %v981_v50 }
 0x59c   : > { %v962_v41 = vpop.permute.xlu0 %961 }
 0x59d   : > { %v985_v42 = vmul.f32 %v962_v41, %v4054_v24  ;;  %v984_v48 = vmul.f32 %v962_v41, %v4051_v0 }
 0x59e   : > { %v957_v34 = vpop.permute.xlu1 %956 }
 0x59f   : > { %v983_v35 = vmul.f32 %v957_v34, %v4034_v7  ;;  %v982_v43 = vmul.f32 %v957_v34, %v4031_v3  ;;  %v979_v3 = vmul.f32 %v947_v33, %v4078_v31  ;;  %v1049_v55 = vmul.f32 %v1026_v36, %v985_v42 }
 0x5a0   : > { %v1048_v58 = vmul.f32 %v1026_v36, %v984_v48  ;;  %v3475_v48 = vld [vmem:[%s5102_s5 + $0x28] sm:$0xff]  }
 0x5a1   : > { %v1047_v17 = vmul.f32 %v1021_v12, %v983_v35  ;;  %v1046_v56 = vmul.f32 %v1021_v12, %v982_v43  ;;  %v1043_v31 = vmul.f32 %v1011_v14, %v979_v3  ;;  %v1113_v22 = vadd.f32 %v1090_v13, %v1049_v55 }
 0x5a2   : > { %v967_v45 = vpop.permute.xlu0 %966  ;;  %v972_v54 = vpop.permute.xlu1 %971  ;;  %v1112_v9 = vadd.f32 %v1090_v13, %v1048_v58 }
 0x5a3   : > { %v986_v46 = vmul.f32 %v967_v45, %v4057_v25  ;;  %v987_v16 = vmul.f32 %v967_v45, %v4060_v26  ;;  %v988_v47 = vmul.f32 %v972_v54, %v4037_v10  ;;  %v989_v49 = vmul.f32 %v972_v54, %v4040_v11 }
 0x5a4   : > { %v980_v26 = vmul.f32 %v952_v40, %v4067_v5  ;;  %v978_v10 = vmul.f32 %v947_v33, %v4075_v4  ;;  %v1111_v6 = vadd.f32 %v1085_v37, %v1047_v17  ;;  %v1110_v62 = vadd.f32 %v1085_v37, %v1046_v56  ;;  %v3476_v17 = vld [vmem:[%s5102_s5 + $0x30] sm:$0xff]  }
 0x5a5   : > { %v1050_v7 = vmul.f32 %v1031_v30, %v986_v46  ;;  %v1051_v51 = vmul.f32 %v1031_v30, %v987_v16  ;;  %v1052_v24 = vmul.f32 %v1036_v29, %v988_v47  ;;  %v1053_v57 = vmul.f32 %v1036_v29, %v989_v49  ;;  %v3472_v46 = vld [vmem:[%s5102_s5 + $0x10] sm:$0xff]   ;;  %v3473_v16 = vld [vmem:[%s5102_s5 + $0x18] sm:$0xff]   ;;  %v3474_v47 = vld [vmem:[%s5102_s5 + $0x20] sm:$0xff]  }
 0x5a6   : > { %v942_v25 = vpop.permute.xlu0 %941  ;;  %v937_v19 = vpop.permute.xlu1 %936  ;;  %v1044_v23 = vmul.f32 %v1016_v38, %v980_v26  ;;  %v1042_v8 = vmul.f32 %v1011_v14, %v978_v10  ;;  %v1147_v4 = vpack.c.bf16 %v1113_v22, %v1111_v6  ;;  %v3477_v49 = vld [vmem:[%s5102_s5 + $0x38] sm:$0xff]  }
 0x5a7   : > { %v1114_v0 = vadd.f32 %v1095_v32, %v1050_v7  ;;  %v1116_v20 = vadd.f32 %v1100_v2, %v1052_v24  ;;  %v1115_v11 = vadd.f32 %v1095_v32, %v1051_v51  ;;  %v1117_v59 = vadd.f32 %v1100_v2, %v1053_v57 }
 0x5a8   : > { %v1146_v2 = vpack.c.bf16 %v1112_v9, %v1110_v62  ;;  %v976_v32 = vmul.f32 %v942_v25, %v4091_v15  ;;  %v977_v36 = vmul.f32 %v942_v25, %v4094_v39  ;;  %v974_v12 = vmul.f32 %v937_v19, %v4097_v44  ;;  %v3470_v44 = vld [vmem:[%s5102_s5] sm:$0xff]  }
 0x5a9   : > { %v1148_v61 = vpack.c.bf16 %v1116_v20, %v1114_v0  ;;  %v1149_v21 = vpack.c.bf16 %v1117_v59, %v1115_v11  ;;  %v975_v37 = vmul.f32 %v937_v19, %v4100_v53  ;;  %v3471_v53 = vld [vmem:[%s5102_s5 + $0x8] sm:$0xff]  }
 0x5aa   : > { %v1080_v63 = vpop.permute.xlu0 %1079  ;;  %v1075_v18 = vpop.permute.xlu1 %1074 }
 0x5ab   : > { %v1109_v5 = vadd.f32 %v1080_v63, %v1045_v60  ;;  %v1107_v1 = vadd.f32 %v1075_v18, %v1043_v31  ;;  %1398 = vmatprep.subr.bf16.mxu0 %v1149_v21  ;;  %v1108_v27 = vadd.f32 %v1080_v63, %v1044_v23  ;;  %v1106_v28 = vadd.f32 %v1075_v18, %v1042_v8 }
 0x5ac   : > { %1399 = vmatpush1.bf16.msra.mxu0 %v1148_v61 }
 0x5ad   : > { %1400 = vmatprep.subr.bf16.mxu0 %v1147_v4  ;;  %v1145_v13 = vpack.c.bf16 %v1109_v5, %v1107_v1  ;;  %v1144_v41 = vpack.c.bf16 %v1108_v27, %v1106_v28 }
 0x5ae   : > { %v1006_v29 = vpop.permute.xlu0 %1005  ;;  %v1001_v30 = vpop.permute.xlu1 %1000 }
 0x5af   : > { %v1040_v38 = vmul.f32 %v1006_v29, %v976_v32  ;;  %v1041_v14 = vmul.f32 %v1006_v29, %v977_v36  ;;  %v1038_v40 = vmul.f32 %v1001_v30, %v974_v12  ;;  %v1039_v33 = vmul.f32 %v1001_v30, %v975_v37 }
 0x5b0   : > { %1401 = vmatpush1.bf16.msra.mxu0 %v1146_v2 }
 0x5b1   : > { %1402 = vmatprep.subr.bf16.mxu0 %v1145_v13 }
 0x5b2   : > { %v1070_v34 = vpop.permute.xlu0 %1069  ;;  %v1065_v35 = vpop.permute.xlu1 %1064 }
 0x5b3   : > { %v1104_v42 = vadd.f32 %v1070_v34, %v1040_v38  ;;  %v1105_v43 = vadd.f32 %v1070_v34, %v1041_v14  ;;  %v1102_v45 = vadd.f32 %v1065_v35, %v1038_v40  ;;  %v1103_v15 = vadd.f32 %v1065_v35, %v1039_v33 }
 0x5b4   : > { %1403 = vmatpush1.bf16.msra.mxu0 %v1144_v41 }
 0x5b5   : > { %v1142_v54 = vpack.c.bf16 %v1104_v42, %v1102_v45  ;;  %v1143_v39 = vpack.c.bf16 %v1105_v43, %v1103_v15 }
 0x5b6   : > { %v1182_v51 = vpop.permute.xlu0 %1181  ;;  %v1177_v24 = vpop.permute.xlu1 %1176 }
 0x5b7   : > { %1404 = vmatprep.subr.bf16.mxu0 %v1143_v39 }
 0x5b8   : > { %1405 = vmatpush1.bf16.msra.mxu0 %v1142_v54 }
 0x5ba   : > { %v1192_v58 = vpop.permute.xlu0 %1191  ;;  %v1187_v11 = vpop.permute.xlu1 %1186 }
 0x5bb   : > { %3139 = vmatmul.mubr.msk.bf16.vlgmr.msra.gmra.mxu0 %vm395_vm0, %v3470_v44 }
 0x5bc   : > { %1432 = vmatprep.mubr.bf16.mxu0 %v5107_v52 }
 0x5be   : > { %v1202_v23 = vpop.permute.xlu0 %1201  ;;  %v1197_v8 = vpop.permute.xlu1 %1196 }
 0x5c2   : > { %v1212_v36 = vpop.permute.xlu0 %1211  ;;  %v1207_v12 = vpop.permute.xlu1 %1206 }
 0x5c3   : > { %3140 = vmatmul.mubr.msk.bf16.gmra.mxu0 %vm395_vm0, %v3471_v53 }
 0x5c4   : > { %1442 = vmatprep.mubr.bf16.mxu0 %v5107_v52 }
 0x5cb   : > { %3141 = vmatmul.mubr.msk.bf16.gmra.mxu0 %vm395_vm0, %v3472_v46 }
 0x5cc   : > { %1452 = vmatprep.mubr.bf16.mxu0 %v5107_v52 }
 0x5d3   : > { %3142 = vmatmul.mubr.msk.bf16.gmra.mxu0 %vm395_vm0, %v3473_v16  ;;  %v1252_v16 = vpop.permute.xlu0 %1251 }
 0x5d4   : > { %1462 = vmatprep.mubr.bf16.mxu0 %v5107_v52 }
 0x5db   : > { %3143 = vmatmul.mubr.msk.bf16.gmra.mxu0 %vm395_vm0, %v3474_v47 }
 0x5dc   : > { %1472 = vmatprep.mubr.bf16.mxu0 %v5107_v52 }
 0x5e3   : > { %3144 = vmatmul.mubr.msk.bf16.gmra.mxu0 %vm395_vm0, %v3475_v48  ;;  %v1247_v48 = vpop.permute.xlu1 %1246 }
 0x5e4   : > { %1482 = vmatprep.mubr.bf16.mxu0 %v5107_v52 }
 0x5eb   : > { %3145 = vmatmul.mubr.msk.bf16.gmra.mxu0 %vm395_vm0, %v3476_v17 }
 0x5ec   : > { %1492 = vmatprep.mubr.bf16.mxu0 %v5107_v52 }
 0x5f3   : > { %3146 = vmatmul.mubr.msk.bf16.gmra.mxu0 %vm395_vm0, %v3477_v49 }
 0x5f4   : > { %1502 = vmatprep.mubr.bf16.mxu0 %v5107_v52 }
 0x67b   : > { %v1424_v50 = vpop.f32.mrf.mxu0 }
 0x67c   : > { %v1425_v55 = vadd.f32 %v1424_v50, %v1177_v24  ;;  %v1242_v50 = vpop.permute.xlu0 %1241 }
 0x67d   : > { %v1426_v7 = vpop.f32.mrf.mxu0 }
 0x67e   : > { %v1427_v25 = vadd.f32 %v1426_v7, %v1177_v24 }
 0x67f   : > { %v1428_v3 = vpop.f32.mrf.mxu0 }
 0x680   : > { %v1429_v56 = vadd.f32 %v1428_v3, %v1182_v51 }
 0x681   : > { %v1430_v57 = vpop.f32.mrf.mxu0 }
 0x682   : > { %v3254_v19 = vpack.c.bf16 %v1429_v56, %v1425_v55  ;;  %v1431_v26 = vadd.f32 %v1430_v57, %v1182_v51  ;;  %v1237_v51 = vpop.permute.xlu1 %1236 }
 0x683   : > { %v1434_v10 = vpop.f32.mrf.mxu0 }
 0x684   : > { %v3255_v0 = vpack.c.bf16 %v1431_v26, %v1427_v25  ;;  %1780 = vxpose.xlu1.c.b16.start [1/4] (short) %v3254_v19, 128  ;;  %v1435_v6 = vadd.f32 %v1434_v10, %v1187_v11  ;;  %v1232_v19 = vpop.permute.xlu0 %1231 }
 0x685   : > { %v1436_v20 = vpop.f32.mrf.mxu0 }
 0x686   : > { %1796 = vxpose.xlu0.c.b16.start [1/4] (short) %v3255_v0, 128  ;;  %v1437_v62 = vadd.f32 %v1436_v20, %v1187_v11  ;;  %v1227_v20 = vpop.permute.xlu1 %1226 }
 0x687   : > { %v1438_v59 = vpop.f32.mrf.mxu0 }
 0x688   : > { %v1439_v60 = vadd.f32 %v1438_v59, %v1192_v58 }
 0x689   : > { %v1440_v61 = vpop.f32.mrf.mxu0 }
 0x68a   : > { %v3256_v63 = vpack.c.bf16 %v1439_v60, %v1435_v6  ;;  %v1441_v31 = vadd.f32 %v1440_v61, %v1192_v58 }
 0x68b   : > { %v1444_v18 = vpop.f32.mrf.mxu0 }
 0x68c   : > { %v3257_v21 = vpack.c.bf16 %v1441_v31, %v1437_v62  ;;  %1781 = vxpose.xlu1.c.b16.cont [2/4] (short) %v3256_v63, 128  ;;  %v1445_v5 = vadd.f32 %v1444_v18, %v1197_v8  ;;  %v1222_v62 = vpop.permute.xlu0 %1221 }
 0x68d   : > { %v1446_v22 = vpop.f32.mrf.mxu0 }
 0x68e   : > { %1797 = vxpose.xlu0.c.b16.cont [2/4] (short) %v3257_v21, 128  ;;  %v1447_v27 = vadd.f32 %v1446_v22, %v1197_v8  ;;  %v1217_v22 = vpop.permute.xlu1 %1216 }
 0x68f   : > { %v1448_v9 = vpop.f32.mrf.mxu0 }
 0x690   : > { %v1449_v1 = vadd.f32 %v1448_v9, %v1202_v23 }
 0x691   : > { %v1450_v4 = vpop.f32.mrf.mxu0 }
 0x692   : > { %v3258_v28 = vpack.c.bf16 %v1449_v1, %v1445_v5  ;;  %v1451_v29 = vadd.f32 %v1450_v4, %v1202_v23 }
 0x693   : > { %v1454_v30 = vpop.f32.mrf.mxu0 }
 0x694   : > { %v3259_v2 = vpack.c.bf16 %v1451_v29, %v1447_v27  ;;  %1782 = vxpose.xlu1.c.b16.cont [3/4] (short) %v3258_v28, 128  ;;  %v1455_v13 = vadd.f32 %v1454_v30, %v1207_v12 }
 0x695   : > { %v1456_v32 = vpop.f32.mrf.mxu0 }
 0x696   : > { %1798 = vxpose.xlu0.c.b16.cont [3/4] (short) %v3259_v2, 128  ;;  %v1457_v40 = vadd.f32 %v1456_v32, %v1207_v12 }
 0x697   : > { %v1458_v37 = vpop.f32.mrf.mxu0 }
 0x698   : > { %v1459_v38 = vadd.f32 %v1458_v37, %v1212_v36 }
 0x699   : > { %v1460_v14 = vpop.f32.mrf.mxu0 }
 0x69a   : > { %v3260_v33 = vpack.c.bf16 %v1459_v38, %v1455_v13  ;;  %v1461_v41 = vadd.f32 %v1460_v14, %v1212_v36 }
 0x69b   : > { %v1464_v34 = vpop.f32.mrf.mxu0 }
 0x69c   : > { %v3261_v35 = vpack.c.bf16 %v1461_v41, %v1457_v40  ;;  %1783 = vxpose.xlu1.c.b16.end [4/4] (short) %v3260_v33, 128  ;;  %v1465_v4 = vadd.f32 %v1464_v34, %v1217_v22 }
 0x69d   : > { %v1466_v42 = vpop.f32.mrf.mxu0 }
 0x69e   : > { %1799 = vxpose.xlu0.c.b16.end [4/4] (short) %v3261_v35, 128  ;;  %v1467_v8 = vadd.f32 %v1466_v42, %v1217_v22 }
 0x69f   : > { %v1468_v43 = vpop.f32.mrf.mxu0 }
 0x6a0   : > { %v1469_v9 = vadd.f32 %v1468_v43, %v1222_v62 }
 0x6a1   : > { %v1470_v45 = vpop.f32.mrf.mxu0 }
 0x6a2   : > { %v1471_v18 = vadd.f32 %v1470_v45, %v1222_v62  ;;  %v3262_v27 = vpack.c.bf16 %v1469_v9, %v1465_v4 }
 0x6a3   : > { %v1474_v15 = vpop.f32.mrf.mxu0 }
 0x6a4   : > { %v1475_v23 = vadd.f32 %v1474_v15, %v1227_v20  ;;  %v3263_v1 = vpack.c.bf16 %v1471_v18, %v1467_v8 }
 0x6a5   : > { %v1476_v54 = vpop.f32.mrf.mxu0 }
 0x6a6   : > { %v1477_v61 = vadd.f32 %v1476_v54, %v1227_v20 }
 0x6a7   : > { %v1478_v39 = vpop.f32.mrf.mxu0 }
 0x6a8   : > { %v1479_v63 = vadd.f32 %v1478_v39, %v1232_v19 }
 0x6a9   : > { %v1480_v44 = vpop.f32.mrf.mxu0 }
 0x6aa   : > { %v1481_v59 = vadd.f32 %v1480_v44, %v1232_v19  ;;  %v3264_v5 = vpack.c.bf16 %v1479_v63, %v1475_v23 }
 0x6ab   : > { %v1484_v53 = vpop.f32.mrf.mxu0 }
 0x6ac   : > { %v1485_v60 = vadd.f32 %v1484_v53, %v1237_v51  ;;  %v3265_v21 = vpack.c.bf16 %v1481_v59, %v1477_v61 }
 0x6ad   : > { %v1486_v46 = vpop.f32.mrf.mxu0 }
 0x6ae   : > { %v1487_v10 = vadd.f32 %v1486_v46, %v1237_v51 }
 0x6af   : > { %v1488_v47 = vpop.f32.mrf.mxu0 }
 0x6b0   : > { %v1489_v58 = vadd.f32 %v1488_v47, %v1242_v50 }
 0x6b1   : > { %v1490_v17 = vpop.f32.mrf.mxu0 }
 0x6b2   : > { %v1491_v56 = vadd.f32 %v1490_v17, %v1242_v50  ;;  %v3266_v31 = vpack.c.bf16 %v1489_v58, %v1485_v60 }
 0x6b3   : > { %v1494_v49 = vpop.f32.mrf.mxu0 }
 0x6b4   : > { %v1495_v26 = vadd.f32 %v1494_v49, %v1247_v48  ;;  %v3267_v6 = vpack.c.bf16 %v1491_v56, %v1487_v10 }
 0x6b5   : > { %v1496_v7 = vpop.f32.mrf.mxu0 }
 0x6b6   : > { %v1497_v57 = vadd.f32 %v1496_v7, %v1247_v48 }
 0x6b7   : > { %v1498_v24 = vpop.f32.mrf.mxu0 }
 0x6b8   : > { %v1499_v3 = vadd.f32 %v1498_v24, %v1252_v16 }
 0x6b9   : > { %v1500_v55 = vpop.f32.mrf.mxu0 }
 0x6ba   : > { %v1501_v25 = vadd.f32 %v1500_v55, %v1252_v16  ;;  %v3268_v11 = vpack.c.bf16 %v1499_v3, %v1495_v26 }
 0x6bc   : > { %v3269_v0 = vpack.c.bf16 %v1501_v25, %v1497_v57 }
 0x6be   : > { %1909 = vmatprep.subr.bf16.mxu1 %v3269_v0 }
 0x6bf   : > { %1910 = vmatpush1.bf16.msra.mxu1 %v3268_v11 }
 0x6c0   : > { %1911 = vmatprep.subr.bf16.mxu1 %v3267_v6 }
 0x6c3   : > { %1912 = vmatpush1.bf16.msra.mxu1 %v3266_v31 }
 0x6c4   : > { %1913 = vmatprep.subr.bf16.mxu1 %v3265_v21 }
 0x6c7   : > { %1914 = vmatpush1.bf16.msra.mxu1 %v3264_v5 }
 0x6c8   : > { %1915 = vmatprep.subr.bf16.mxu1 %v3263_v1 }
 0x6cb   : > { %1916 = vmatpush1.bf16.msra.mxu1 %v3262_v27 }
 0x6f2   : > { %v1788_v28 = vpop.trf.xlu1 }
 0x6f3   : > { %3191 = vmatmul.mubr.msk.bf16.vlgmr.msra.gmra.mxu1 %vm395_vm0, %v1788_v28 }
 0x6f4   : > { %1943 = vmatprep.mubr.bf16.mxu1 %v5107_v52  ;;  %v1804_v13 = vpop.trf.xlu0 }
 0x6f6   : > { %v1789_v29 = vpop.trf.xlu1 }
 0x6f8   : > { %v1805_v38 = vpop.trf.xlu0 }
 0x6fa   : > { %v1790_v30 = vpop.trf.xlu1 }
 0x6fb   : > { %3192 = vmatmul.mubr.msk.bf16.gmra.mxu1 %vm395_vm0, %v1789_v29 }
 0x6fc   : > { %1953 = vmatprep.mubr.bf16.mxu1 %v5107_v52  ;;  %v1806_v14 = vpop.trf.xlu0 }
 0x6fe   : > { %v1791_v2 = vpop.trf.xlu1 }
 0x700   : > { %v1807_v40 = vpop.trf.xlu0 }
 0x702   : > { %v1792_v32 = vpop.trf.xlu1 }
 0x703   : > { %3193 = vmatmul.mubr.msk.bf16.gmra.mxu1 %vm395_vm0, %v1790_v30 }
 0x704   : > { %1963 = vmatprep.mubr.bf16.mxu1 %v5107_v52  ;;  %v1808_v33 = vpop.trf.xlu0 }
 0x706   : > { %v1793_v36 = vpop.trf.xlu1 }
 0x708   : > { %v1809_v41 = vpop.trf.xlu0 }
 0x70a   : > { %v1794_v12 = vpop.trf.xlu1 }
 0x70b   : > { %3194 = vmatmul.mubr.msk.bf16.gmra.mxu1 %vm395_vm0, %v1791_v2 }
 0x70c   : > { %1973 = vmatprep.mubr.bf16.mxu1 %v5107_v52  ;;  %v1810_v34 = vpop.trf.xlu0 }
 0x70e   : > { %v1795_v37 = vpop.trf.xlu1 }
 0x710   : > { %v1811_v35 = vpop.trf.xlu0 }
 0x713   : > { %3195 = vmatmul.mubr.msk.bf16.gmra.mxu1 %vm395_vm0, %v1792_v32 }
 0x714   : > { %1983 = vmatprep.mubr.bf16.mxu1 %v5107_v52 }
 0x71b   : > { %3196 = vmatmul.mubr.msk.bf16.gmra.mxu1 %vm395_vm0, %v1793_v36 }
 0x71c   : > { %1993 = vmatprep.mubr.bf16.mxu1 %v5107_v52 }
 0x723   : > { %3197 = vmatmul.mubr.msk.bf16.gmra.mxu1 %vm395_vm0, %v1794_v12 }
 0x724   : > { %2003 = vmatprep.mubr.bf16.mxu1 %v5107_v52 }
 0x72b   : > { %3198 = vmatmul.mubr.msk.bf16.gmra.mxu1 %vm395_vm0, %v1795_v37 }
 0x72c   : > { %2013 = vmatprep.mubr.bf16.mxu1 %v5107_v52 }
 0x733   : > { %3199 = vmatmul.mubr.msk.bf16.gmra.mxu1 %vm395_vm0, %v1804_v13 }
 0x734   : > { %2023 = vmatprep.mubr.bf16.mxu1 %v5107_v52 }
 0x73b   : > { %3200 = vmatmul.mubr.msk.bf16.gmra.mxu1 %vm395_vm0, %v1805_v38 }
 0x73c   : > { %2033 = vmatprep.mubr.bf16.mxu1 %v5107_v52 }
 0x743   : > { %3201 = vmatmul.mubr.msk.bf16.gmra.mxu1 %vm395_vm0, %v1806_v14 }
 0x744   : > { %2043 = vmatprep.mubr.bf16.mxu1 %v5107_v52 }
 0x74b   : > { %3202 = vmatmul.mubr.msk.bf16.gmra.mxu1 %vm395_vm0, %v1807_v40 }
 0x74c   : > { %2053 = vmatprep.mubr.bf16.mxu1 %v5107_v52 }
 0x753   : > { %3203 = vmatmul.mubr.msk.bf16.gmra.mxu1 %vm395_vm0, %v1808_v33 }
 0x754   : > { %2063 = vmatprep.mubr.bf16.mxu1 %v5107_v52 }
 0x75b   : > { %3204 = vmatmul.mubr.msk.bf16.gmra.mxu1 %vm395_vm0, %v1809_v41 }
 0x75c   : > { %2073 = vmatprep.mubr.bf16.mxu1 %v5107_v52 }
 0x763   : > { %3205 = vmatmul.mubr.msk.bf16.gmra.mxu1 %vm395_vm0, %v1810_v34 }
 0x764   : > { %2083 = vmatprep.mubr.bf16.mxu1 %v5107_v52 }
 0x76b   : > { %3206 = vmatmul.mubr.msk.bf16.gmra.mxu1 %vm395_vm0, %v1811_v35 }
 0x76c   : > { %2911 = vmatprep.mubr.bf16.mxu1 %v5107_v52 }
 0x7b3   : > { %v4316_v42 = vpop.f32.mrf.mxu1 }
 0x7b5   : > { %v4318_v43 = vpop.f32.mrf.mxu1 }
 0x7b7   : > { %v4320_v45 = vpop.f32.mrf.mxu1 }
 0x7b9   : > { %v4322_v15 = vpop.f32.mrf.mxu1 }
 0x7bb   : > { %v4324_v54 = vpop.f32.mrf.mxu1 }
 0x7bd   : > { %v4326_v39 = vpop.f32.mrf.mxu1 }
 0x7bf   : > { %v4328_v44 = vpop.f32.mrf.mxu1 }
 0x7c1   : > { %v4330_v53 = vpop.f32.mrf.mxu1 }
 0x7c3   : > { %v4332_v46 = vpop.f32.mrf.mxu1 }
 0x7c5   : > { %v1957_v16 = vpop.f32.mrf.mxu1 }
 0x7c7   : > { %v4334_v47 = vpop.f32.mrf.mxu1 }
 0x7c9   : > { %v4336_v48 = vpop.f32.mrf.mxu1 }
 0x7cb   : > { %v1965_v17 = vpop.f32.mrf.mxu1 }
 0x7cc   : > { %v4396_v34 = vmul.f32 0.125, %v1965_v17  ;;  %v4413_v17 = vmul.f32 0.125, %v4332_v46 }
 0x7cd   : > { %v1967_v49 = vpop.f32.mrf.mxu1 }
 0x7ce   : > { %v4386_v38 = vmul.f32 0.125, %v1967_v49  ;;  %v4402_v49 = vmul.f32 0.125, %v1957_v16  ;;  %v4420_v16 = vmul.f32 0.125, %v4326_v39 }
 0x7cf   : > { %v1969_v50 = vpop.f32.mrf.mxu1 }
 0x7d1   : > { %v1971_v7 = vpop.f32.mrf.mxu1 }
 0x7d3   : > { %v1975_v51 = vpop.f32.mrf.mxu1 }
 0x7d4   : > { %v4380_v12 = vmul.f32 0.125, %v1975_v51 }
 0x7d5   : > { %v1977_v24 = vpop.f32.mrf.mxu1 }
 0x7d6   : > { %v4370_v29 = vmul.f32 0.125, %v1977_v24  ;;  %v4404_v24 = vmul.f32 0.125, %v1971_v7  ;;  %v4423_v7 = vmul.f32 0.125, %v4336_v48  ;;  %v4440_v48 = vmul.f32 0.125, %v4318_v43 }
 0x7d7   : > { %v1979_v3 = vpop.f32.mrf.mxu1 }
 0x7d8   : > { %v2182_v40 = vmax.f32 %v4380_v12, %v4370_v29  ;;  %v4398_v35 = vmul.f32 0.125, %v1979_v3  ;;  %v4415_v3 = vmul.f32 0.125, %v1969_v50  ;;  %v4432_v50 = vmul.f32 0.125, %v4324_v54 }
 0x7d9   : > { %v1981_v55 = vpop.f32.mrf.mxu1 }
 0x7da   : > { %v4388_v14 = vmul.f32 0.125, %v1981_v55  ;;  %v2176_v55 = vmax.f32 %v4396_v34, %v4386_v38 }
 0x7db   : > { %v1985_v56 = vpop.f32.mrf.mxu1 }
 0x7dc   : > { %v4364_v4 = vmul.f32 0.125, %v1985_v56  ;;  %v2185_v56 = vmax.f32 %v4398_v35, %v4388_v14 }
 0x7dd   : > { %v1987_v57 = vpop.f32.mrf.mxu1 }
 0x7de   : > { %v4354_v23 = vmul.f32 0.125, %v1987_v57 }
 0x7df   : > { %v1989_v25 = vpop.f32.mrf.mxu1 }
 0x7e0   : > { %v2188_v2 = vmax.f32 %v4364_v4, %v4354_v23  ;;  %v4382_v37 = vmul.f32 0.125, %v1989_v25 }
 0x7e1   : > { %v1991_v19 = vpop.f32.mrf.mxu1 }
 0x7e2   : > { %v4372_v30 = vmul.f32 0.125, %v1991_v19  ;;  %v2170_v19 = vmax.f32 %v4413_v17, %v4402_v49 }
 0x7e3   : > { %v1995_v26 = vpop.f32.mrf.mxu1 }
 0x7e4   : > { %v4346_v31 = vmul.f32 0.125, %v1995_v26  ;;  %v2191_v33 = vmax.f32 %v4382_v37, %v4372_v30  ;;  %v2179_v26 = vmax.f32 %v4415_v3, %v4404_v24 }
 0x7e5   : > { %v1997_v10 = vpop.f32.mrf.mxu1 }
 0x7e6   : > { %v4342_v61 = vmul.f32 0.125, %v1997_v10  ;;  %v4435_v10 = vmul.f32 0.125, %v4334_v47  ;;  %v4452_v47 = vmul.f32 0.125, %v4316_v42  ;;  %v4469_v42 = vmul.f32 0.125, %v4320_v45 }
 0x7e7   : > { %v1999_v0 = vpop.f32.mrf.mxu1 }
 0x7e8   : > { %v2194_v9 = vmax.f32 %v4346_v31, %v4342_v61  ;;  %v4366_v27 = vmul.f32 0.125, %v1999_v0  ;;  %v4443_v0 = vmul.f32 0.125, %v4330_v53  ;;  %v2173_v54 = vmax.f32 %v4435_v10, %v4423_v7  ;;  %5144 = vst [vmem:[#allocation14_spill] sm:$0xff] %v4469_v42 }
 0x7e9   : > { %v2001_v20 = vpop.f32.mrf.mxu1  ;;  %v4460_v53 = vmul.f32 0.125, %v4322_v15 }
 0x7ea   : > { %v4356_v8 = vmul.f32 0.125, %v2001_v20  ;;  %5141 = vst [vmem:[#allocation11_spill] sm:$0xff] %v4443_v0  ;;  %v2164_v20 = vmax.f32 %v4432_v50, %v4420_v16 }
 0x7eb   : > { %v2005_v58 = vpop.f32.mrf.mxu1  ;;  %5143 = vst [vmem:[#allocation13_spill] sm:$0xff] %v4460_v53 }
 0x7ec   : > { %v4338_v59 = vmul.f32 0.125, %v2005_v58  ;;  %v2197_v32 = vmax.f32 %v4366_v27, %v4356_v8 }
 0x7ed   : > { %v2007_v11 = vpop.f32.mrf.mxu1 }
 0x7ee   : > { %v4340_v6 = vmul.f32 0.125, %v2007_v11  ;;  %v4455_v11 = vmul.f32 0.125, %v4328_v44 }
 0x7ef   : > { %v2009_v60 = vpop.f32.mrf.mxu1 }
 0x7f0   : > { %v2200_v62 = vmax.f32 %v4338_v59, %v4340_v6  ;;  %v4348_v18 = vmul.f32 0.125, %v2009_v60  ;;  %5142 = vst [vmem:[#allocation12_spill] sm:$0xff] %v4455_v11  ;;  %v2167_v60 = vmax.f32 %v4455_v11, %v4443_v0 }
 0x7f1   : > { %v2011_v63 = vpop.f32.mrf.mxu1 }
 0x7f2   : > { %v4350_v21 = vmul.f32 0.125, %v2011_v63  ;;  %2201 = vmax.xlane.f32.xlu0 %v2200_v62  ;;  %v2158_v62 = vmax.f32 %v4452_v47, %v4440_v48 }
 0x7f3   : > { %v4352_v22 = vpop.f32.mrf.mxu1 }
 0x7f4   : > { %5136 = vst [vmem:[#allocation6_spill] sm:$0xff] %v4352_v22  ;;  %v2203_v5 = vmax.f32 %v4348_v18, %v4350_v21 }
 0x7f5   : > { %v4362_v1 = vpop.f32.mrf.mxu1 }
 0x7f6   : > { %5137 = vst [vmem:[#allocation7_spill] sm:$0xff] %v4362_v1  ;;  %2195 = vmax.xlane.f32.xlu0 %v2194_v9  ;;  %2204 = vmax.xlane.f32.xlu1 %v2203_v5  ;;  %v2161_v9 = vmax.f32 %v4469_v42, %v4460_v53 }
 0x7f7   : > { %v4368_v28 = vpop.f32.mrf.mxu1 }
 0x7f8   : > { %5138 = vst [vmem:[#allocation8_spill] sm:$0xff] %v4368_v28 }
 0x7f9   : > { %v4378_v36 = vpop.f32.mrf.mxu1 }
 0x7fa   : > { %5139 = vst [vmem:[#allocation9_spill] sm:$0xff] %v4378_v36  ;;  %2189 = vmax.xlane.f32.xlu0 %v2188_v2  ;;  %2198 = vmax.xlane.f32.xlu1 %v2197_v32 }
 0x7fb   : > { %v4384_v13 = vpop.f32.mrf.mxu1 }
 0x7fd   : > { %v4394_v41 = vpop.f32.mrf.mxu1 }
 0x7fe   : > { %2183 = vmax.xlane.f32.xlu0 %v2182_v40  ;;  %2192 = vmax.xlane.f32.xlu1 %v2191_v33 }
 0x7ff   : > { %v4400_v51 = vpop.f32.mrf.mxu1 }
 0x801   : > { %v4410_v57 = vpop.f32.mrf.mxu1 }
 0x802   : > { %5140 = vst [vmem:[#allocation10_spill] sm:$0xff] %v4410_v57  ;;  %2177 = vmax.xlane.f32.xlu0 %v2176_v55  ;;  %2186 = vmax.xlane.f32.xlu1 %v2185_v56 }
 0x803   : > { %v4417_v25 = vpop.f32.mrf.mxu1 }
 0x805   : > { %v4429_v46 = vpop.f32.mrf.mxu1 }
 0x806   : > { %2171 = vmax.xlane.f32.xlu0 %v2170_v19  ;;  %2180 = vmax.xlane.f32.xlu1 %v2179_v26 }
 0x807   : > { %v4437_v39 = vpop.f32.mrf.mxu1 }
 0x809   : > { %v4449_v58 = vpop.f32.mrf.mxu1 }
 0x80a   : > { %2165 = vmax.xlane.f32.xlu0 %v2164_v20  ;;  %2174 = vmax.xlane.f32.xlu1 %v2173_v54 }
 0x80b   : > { %v4457_v43 = vpop.f32.mrf.mxu1 }
 0x80d   : > { %v4466_v63 = vpop.f32.mrf.mxu1 }
 0x80e   : > { %2159 = vmax.xlane.f32.xlu0 %v2158_v62  ;;  %2168 = vmax.xlane.f32.xlu1 %v2167_v60 }
 0x80f   : > { %v4471_v44 = vpop.f32.mrf.mxu1 }
 0x811   : > { %v4475_v15 = vpop.f32.mrf.mxu1 }
 0x812   : > { %2162 = vmax.xlane.f32.xlu1 %v2161_v9 }
 0x813   : > { %v2055_v5 = vpop.f32.mrf.mxu1 }
 0x815   : > { %v2057_v2 = vpop.f32.mrf.mxu1 }
 0x817   : > { %v2059_v32 = vpop.f32.mrf.mxu1 }
 0x819   : > { %v2061_v40 = vpop.f32.mrf.mxu1 }
 0x81b   : > { %v2065_v33 = vpop.f32.mrf.mxu1 }
 0x81c   : > { %v4489_v22 = vmul.f32 0.125, %v2065_v33  ;;  %v4505_v33 = vmul.f32 0.125, %v2057_v2 }
 0x81d   : > { %v2067_v55 = vpop.f32.mrf.mxu1 }
 0x81e   : > { %v4491_v0 = vmul.f32 0.125, %v2067_v55  ;;  %5146 = vst [vmem:[#allocation16_spill] sm:$0xff] %v4505_v33 }
 0x81f   : > { %v2069_v56 = vpop.f32.mrf.mxu1 }
 0x820   : > { %v4507_v55 = vmul.f32 0.125, %v2069_v56 }
 0x821   : > { %v2071_v19 = vpop.f32.mrf.mxu1 }
 0x822   : > { %5147 = vst [vmem:[#allocation17_spill] sm:$0xff] %v4507_v55 }
 0x823   : > { %v2075_v45 = vpop.f32.mrf.mxu1 }
 0x824   : > { %v4479_v36 = vmul.f32 0.125, %v2075_v45 }
 0x825   : > { %v2077_v26 = vpop.f32.mrf.mxu1 }
 0x826   : > { %v4481_v28 = vmul.f32 0.125, %v2077_v26  ;;  %v4503_v26 = vmul.f32 0.125, %v2055_v5 }
 0x827   : > { %v2079_v20 = vpop.f32.mrf.mxu1 }
 0x828   : > { %v2230_v2 = vmax.f32 %v4503_v26, %v4505_v33 }
 0x829   : > { %v2081_v54 = vpop.f32.mrf.mxu1 }
 0x82a   : > { %v4495_v57 = vmul.f32 0.125, %v2081_v54  ;;  %v4517_v54 = vmul.f32 0.125, %v2061_v40  ;;  %v5151_v40 = vmov 0  }
 0x82b   : > { %v2085_v60 = vpop.f32.mrf.mxu1 }
 0x82c   : > { %v4477_v62 = vmul.f32 0.125, %v2085_v60  ;;  %v4493_v60 = vmul.f32 0.125, %v2079_v20  ;;  %5150 = vst [vmem:[#allocation20_spill] sm:$0xff] %v4517_v54 }
 0x82d   : > { %v2087_v52 = vpop.f32.mrf.mxu1 }
 0x82e   : > { %v4483_v9 = vmul.f32 0.125, %v2087_v52  ;;  %v2242_v52 = vmax.f32 %v4479_v36, %v4481_v28  ;;  %v2245_v20 = vmax.f32 %v4493_v60, %v4495_v57 }
 0x82f   : > { %v2089_v53 = vpop.f32.mrf.mxu1 }
 0x830   : > { %5145 = vst [vmem:[#allocation15_spill] sm:$0xff] %v4483_v9  ;;  %v4485_v42 = vmul.f32 0.125, %v2089_v53  ;;  %v2248_v1 = vmax.f32 %v4477_v62, %v4483_v9  ;;  %v4509_v9 = vmul.f32 0.125, %v2071_v19  ;;  %v3479_v19 = vld [vmem:[%s5102_s5 + $0x48] sm:$0xff]  }
 0x831   : > { %v2091_v11 = vpop.f32.mrf.mxu1 }
 0x832   : > { %v4497_v45 = vmul.f32 0.125, %v2091_v11  ;;  %2249 = vmax.xlane.f32.xlu0 %v2248_v1  ;;  %5148 = vst [vmem:[#allocation18_spill] sm:$0xff] %v4509_v9  ;;  %v2236_v1 = vmax.f32 %v4489_v22, %v4491_v0  ;;  %v4515_v11 = vmul.f32 0.125, %v2059_v32  ;;  %v2239_v5 = vmax.f32 %v4507_v55, %v4509_v9  ;;  %v3478_v32 = vld [vmem:[%s5102_s5 + $0x40] sm:$0xff]  }
 0x833   : > { %3147 = vmatmul.mubr.msk.bf16.gmra.mxu0 %vm395_vm0, %v3478_v32 }
 0x834   : > { %v2251_v53 = vmax.f32 %v4485_v42, %v4497_v45  ;;  %5149 = vst [vmem:[#allocation19_spill] sm:$0xff] %v4515_v11  ;;  %v2233_v56 = vmax.f32 %v4515_v11, %v4517_v54  ;;  %1512 = vmatprep.mubr.bf16.mxu0 %v5151_v40 }
 0x836   : > { %2243 = vmax.xlane.f32.xlu0 %v2242_v52  ;;  %2252 = vmax.xlane.f32.xlu1 %v2251_v53  ;;  %v3480_v52 = vld [vmem:[%s5102_s5 + $0x50] sm:$0xff]  }
 0x83a   : > { %2237 = vmax.xlane.f32.xlu0 %v2236_v1  ;;  %2246 = vmax.xlane.f32.xlu1 %v2245_v20 }
 0x83b   : > { %3148 = vmatmul.mubr.msk.bf16.gmra.mxu0 %vm395_vm0, %v3479_v19 }
 0x83c   : > { %1522 = vmatprep.mubr.bf16.mxu0 %v5151_v40 }
 0x83e   : > { %2231 = vmax.xlane.f32.xlu0 %v2230_v2  ;;  %2240 = vmax.xlane.f32.xlu1 %v2239_v5 }
 0x842   : > { %2234 = vmax.xlane.f32.xlu1 %v2233_v56 }
 0x843   : > { %3149 = vmatmul.mubr.msk.bf16.gmra.mxu0 %vm395_vm0, %v3480_v52 }
 0x844   : > { %1532 = vmatprep.mubr.bf16.mxu0 %v5151_v40 }
 0x87b   : > { %v2202_v53 = vpop.xlane.xlu0 %2201 }
 0x87c   : > { %v2282_v20 = vsub.f32 %v4338_v59, %v2202_v53  ;;  %v2283_v1 = vsub.f32 %v4340_v6, %v2202_v53 }
 0x87e   : > { %v2374_v5 = vmul.f32 1.442695, %v2282_v20  ;;  %v2376_v2 = vmul.f32 1.442695, %v2283_v1 }
 0x87f   : > { %v2196_v56 = vpop.xlane.xlu0 %2195  ;;  %v2205_v32 = vpop.xlane.xlu1 %2204 }
 0x880   : > { %3494 = vpow2.f32 %v2374_v5  ;;  %v2278_v19 = vsub.f32 %v4346_v31, %v2196_v56  ;;  %v2279_v54 = vsub.f32 %v4342_v61, %v2196_v56  ;;  %v2284_v11 = vsub.f32 %v4348_v18, %v2205_v32 }
 0x881   : > { %3496 = vpow2.f32 %v2376_v2  ;;  %v2285_v52 = vsub.f32 %v4350_v21, %v2205_v32 }
 0x882   : > { %v2366_v40 = vmul.f32 1.442695, %v2278_v19  ;;  %v2368_v9 = vmul.f32 1.442695, %v2279_v54  ;;  %v2378_v55 = vmul.f32 1.442695, %v2284_v11 }
 0x883   : > { %v2380_v59 = vmul.f32 1.442695, %v2285_v52  ;;  %v2190_v33 = vpop.xlane.xlu0 %2189  ;;  %v2199_v6 = vpop.xlane.xlu1 %2198 }
 0x884   : > { %3498 = vpow2.f32 %v2366_v40  ;;  %v2280_v53 = vsub.f32 %v4366_v27, %v2199_v6  ;;  %v2281_v20 = vsub.f32 %v4356_v8, %v2199_v6  ;;  %v2274_v61 = vsub.f32 %v4364_v4, %v2190_v33 }
 0x885   : > { %3500 = vpow2.f32 %v2368_v9  ;;  %v2275_v31 = vsub.f32 %v4354_v23, %v2190_v33  ;;  %v4557_v23 = vmul.f32 0.125, %v4457_v43 }
 0x886   : > { %3502 = vpow2.f32 %v2378_v55  ;;  %v2370_v1 = vmul.f32 1.442695, %v2280_v53  ;;  %v2372_v54 = vmul.f32 1.442695, %v2281_v20  ;;  %v2358_v11 = vmul.f32 1.442695, %v2274_v61 }
 0x887   : > { %3504 = vpow2.f32 %v2380_v59  ;;  %v2184_v18 = vpop.xlane.xlu0 %2183  ;;  %v2193_v21 = vpop.xlane.xlu1 %2192  ;;  %v2360_v5 = vmul.f32 1.442695, %v2275_v31  ;;  %v4561_v55 = vmul.f32 0.125, %v4466_v63  ;;  %v4577_v20 = vmul.f32 0.125, %v4471_v44 }
 0x888   : > { %3506 = vpow2.f32 %v2370_v1  ;;  %v2276_v40 = vsub.f32 %v4382_v37, %v2193_v21  ;;  %v2277_v8 = vsub.f32 %v4372_v30, %v2193_v21  ;;  %v2270_v33 = vsub.f32 %v4380_v12, %v2184_v18 }
 0x889   : > { %3508 = vpow2.f32 %v2372_v54  ;;  %v2271_v37 = vsub.f32 %v4370_v29, %v2184_v18  ;;  %v2224_v12 = vmax.f32 %v4557_v23, %v4561_v55  ;;  %v4581_v31 = vmul.f32 0.125, %v4475_v15 }
 0x88a   : > { %3510 = vpow2.f32 %v2358_v11  ;;  %v2362_v30 = vmul.f32 1.442695, %v2276_v40  ;;  %v2364_v19 = vmul.f32 1.442695, %v2277_v8  ;;  %v2350_v43 = vmul.f32 1.442695, %v2270_v33 }
 0x88b   : > { %v2178_v27 = vpop.xlane.xlu0 %2177  ;;  %v2187_v9 = vpop.xlane.xlu1 %2186  ;;  %3512 = vpow2.f32 %v2360_v5  ;;  %v2352_v63 = vmul.f32 1.442695, %v2271_v37  ;;  %v4587_v1 = vmul.f32 0.125, %v4417_v25  ;;  %v4591_v54 = vmul.f32 0.125, %v4429_v46 }
 0x88c   : > { %3514 = vpow2.f32 %v2362_v30  ;;  %v2272_v61 = vsub.f32 %v4398_v35, %v2187_v9  ;;  %v2273_v18 = vsub.f32 %v4388_v14, %v2187_v9  ;;  %v2266_v44 = vsub.f32 %v4396_v34, %v2178_v27 }
 0x88d   : > { %v4551_v2 = vpop.eup %3494  ;;  %3516 = vpow2.f32 %v2364_v19  ;;  %v2267_v35 = vsub.f32 %v4386_v38, %v2178_v27  ;;  %v2227_v25 = vmax.f32 %v4577_v20, %v4581_v31  ;;  %v2218_v27 = vmax.f32 %v4587_v1, %v4591_v54 }
 0x88e   : > { %v4554_v4 = vpop.eup %3496  ;;  %3518 = vpow2.f32 %v2350_v43  ;;  %v2354_v15 = vmul.f32 1.442695, %v2272_v61  ;;  %v2356_v5 = vmul.f32 1.442695, %v2273_v18  ;;  %v2342_v46 = vmul.f32 1.442695, %v2266_v44 }
 0x88f   : > { %v2488_v56 = vadd.f32 %v4554_v4, %v4551_v2  ;;  %v2172_v6 = vpop.xlane.xlu0 %2171  ;;  %v2181_v53 = vpop.xlane.xlu1 %2180  ;;  %3520 = vpow2.f32 %v2352_v63  ;;  %v2344_v33 = vmul.f32 1.442695, %v2267_v35  ;;  %v4611_v30 = vmul.f32 0.125, %v4384_v13 }
 0x890   : > { %v2262_v9 = vsub.f32 %v4413_v17, %v2172_v6  ;;  %v2263_v37 = vsub.f32 %v4402_v49, %v2172_v6  ;;  %v4614_v19 = vmul.f32 0.125, %v4437_v39  ;;  %3522 = vpow2.f32 %v2354_v15 }
 0x891   : > { %v4566_v32 = vpop.eup %3498  ;;  %2489 = vadd.xlane.f32.xlu0 %v2488_v56  ;;  %v2268_v17 = vsub.f32 %v4415_v3, %v2181_v53  ;;  %v4618_v43 = vmul.f32 0.125, %v4449_v58  ;;  %3524 = vpow2.f32 %v2356_v5  ;;  %v4624_v63 = vmul.f32 0.125, %v4394_v41 }
 0x892   : > { %v4568_v52 = vpop.eup %3500  ;;  %3526 = vpow2.f32 %v2342_v46  ;;  %v2334_v13 = vmul.f32 1.442695, %v2262_v9  ;;  %v2336_v6 = vmul.f32 1.442695, %v2263_v37  ;;  %v4647_v5 = vmul.f32 0.125, %v4400_v51  ;;  %v5152_v46 = vld [vmem:[#allocation10_spill] sm:$0xff] }
 0x893   : > { %v4570_v59 = vpop.eup %3502  ;;  %v2482_v14 = vadd.f32 %v4568_v52, %v4566_v32  ;;  %v2166_v40 = vpop.xlane.xlu0 %2165  ;;  %3528 = vpow2.f32 %v2344_v33  ;;  %v2221_v41 = vmax.f32 %v4614_v19, %v4618_v43  ;;  %v4653_v9 = vmul.f32 0.125, %v5152_v46  ;;  %v5154_v51 = vld [vmem:[#allocation11_spill] sm:$0xff]  ;;  %v5159_v46 = vld [vmem:[#allocation8_spill] sm:$0xff] }
 0x894   : > { %v4574_v29 = vpop.eup %3504  ;;  %v2175_v8 = vpop.xlane.xlu1 %2174  ;;  %v2258_v39 = vsub.f32 %v4432_v50, %v2166_v40  ;;  %v2259_v3 = vsub.f32 %v4420_v16, %v2166_v40  ;;  %v2212_v16 = vmax.f32 %v4611_v30, %v4624_v63  ;;  %3530 = vpow2.f32 %v2334_v13 }
 0x895   : > { %2225 = vmax.xlane.f32.xlu0 %v2224_v12  ;;  %v2491_v21 = vadd.f32 %v4574_v29, %v4570_v59  ;;  %v4596_v11 = vpop.eup %3506  ;;  %v2269_v12 = vsub.f32 %v4404_v24, %v2181_v53  ;;  %v2346_v53 = vmul.f32 1.442695, %v2268_v17  ;;  %v2264_v18 = vsub.f32 %v4435_v10, %v2175_v8  ;;  %v3481_v10 = vld [vmem:[%s5102_s5 + $0x58] sm:$0xff]  }
 0x896   : > { %v4600_v34 = vpop.eup %3508  ;;  %v2265_v50 = vsub.f32 %v4423_v7, %v2175_v8  ;;  %3532 = vpow2.f32 %v2336_v6  ;;  %v2328_v7 = vmul.f32 1.442695, %v2259_v3  ;;  %3150 = vmatmul.mubr.msk.bf16.gmra.mxu0 %vm395_vm0, %v3481_v10  ;;  %v5156_v6 = vld [vmem:[#allocation7_spill] sm:$0xff] }
 0x897   : > { %2492 = vadd.xlane.f32.xlu1 %v2491_v21  ;;  %v4603_v38 = vpop.eup %3510  ;;  %v2485_v49 = vadd.f32 %v4600_v34, %v4596_v11  ;;  %v2160_v58 = vpop.xlane.xlu0 %2159  ;;  %v2348_v44 = vmul.f32 1.442695, %v2269_v12  ;;  %3534 = vpow2.f32 %v2346_v53  ;;  %v4664_v3 = vmul.f32 0.125, %v5156_v6  ;;  %v5157_v53 = vld [vmem:[#allocation14_spill] sm:$0xff] }
 0x898   : > { %v4608_v56 = vpop.eup %3512  ;;  %v2169_v61 = vpop.xlane.xlu1 %2168  ;;  %v2254_v15 = vsub.f32 %v4452_v47, %v2160_v58  ;;  %v2255_v40 = vsub.f32 %v4440_v48, %v2160_v58  ;;  %v2338_v47 = vmul.f32 1.442695, %v2264_v18  ;;  %v2340_v37 = vmul.f32 1.442695, %v2265_v50 }
 0x899   : > { %2483 = vadd.xlane.f32.xlu0 %v2482_v14  ;;  %v2476_v24 = vadd.f32 %v4608_v56, %v4603_v38  ;;  %v4631_v21 = vpop.eup %3514  ;;  %v2326_v14 = vmul.f32 1.442695, %v2258_v39  ;;  %3536 = vpow2.f32 %v2348_v44  ;;  %v2261_v17 = vsub.f32 %v5154_v51, %v2169_v61 }
 0x89a   : > { %v4636_v35 = vpop.eup %3516  ;;  %v2318_v39 = vmul.f32 1.442695, %v2254_v15  ;;  %v2320_v58 = vmul.f32 1.442695, %v2255_v40  ;;  %v2215_v44 = vmax.f32 %v4647_v5, %v4653_v9 }
 0x89b   : > { %2228 = vmax.xlane.f32.xlu1 %v2227_v25  ;;  %v4644_v25 = vpop.eup %3518  ;;  %v2479_v48 = vadd.f32 %v4636_v35, %v4631_v21  ;;  %3538 = vpow2.f32 %v2326_v14  ;;  %v2332_v50 = vmul.f32 1.442695, %v2261_v17 }
 0x89c   : > { %v4650_v8 = vpop.eup %3520  ;;  %v2163_v12 = vpop.xlane.xlu1 %2162  ;;  %3540 = vpow2.f32 %v2328_v7 }
 0x89d   : > { %2219 = vmax.xlane.f32.xlu0 %v2218_v27  ;;  %v5153_v27 = vld [vmem:[#allocation12_spill] sm:$0xff]  ;;  %3542 = vpow2.f32 %v2338_v47  ;;  %v2256_v18 = vsub.f32 %v5157_v53, %v2163_v12  ;;  %v4683_v47 = vmul.f32 0.125, %v5159_v46 }
 0x89e   : > { %v2260_v33 = vsub.f32 %v5153_v27, %v2169_v61  ;;  %3544 = vpow2.f32 %v2340_v37 }
 0x89f   : > { %2486 = vadd.xlane.f32.xlu1 %v2485_v49  ;;  %v5155_v49 = vld [vmem:[#allocation6_spill] sm:$0xff]  ;;  %3546 = vpow2.f32 %v2318_v39  ;;  %v2322_v27 = vmul.f32 1.442695, %v2256_v18 }
 0x8a0   : > { %v4661_v13 = vmul.f32 0.125, %v5155_v49  ;;  %v2330_v61 = vmul.f32 1.442695, %v2260_v33  ;;  %3548 = vpow2.f32 %v2320_v58  ;;  %v5160_v33 = vld [vmem:[#allocation9_spill] sm:$0xff] }
 0x8a1   : > { %2477 = vadd.xlane.f32.xlu0 %v2476_v24  ;;  %v2470_v24 = vadd.f32 %v4650_v8, %v4644_v25  ;;  %v4686_v37 = vmul.f32 0.125, %v5160_v33 }
 0x8a2   : > { %v2206_v7 = vmax.f32 %v4661_v13, %v4664_v3  ;;  %3550 = vpow2.f32 %v2330_v61 }
 0x8a3   : > { %2222 = vmax.xlane.f32.xlu1 %v2221_v41  ;;  %v4669_v41 = vpop.eup %3522  ;;  %3552 = vpow2.f32 %v2332_v50  ;;  %v2209_v6 = vmax.f32 %v4683_v47, %v4686_v37 }
 0x8a4   : > { %v4674_v15 = vpop.eup %3524  ;;  %3554 = vpow2.f32 %v2322_v27 }
 0x8a5   : > { %2213 = vmax.xlane.f32.xlu0 %v2212_v16  ;;  %v5158_v16 = vld [vmem:[#allocation13_spill] sm:$0xff]  ;;  %v4676_v10 = vpop.eup %3526  ;;  %v2473_v17 = vadd.f32 %v4674_v15, %v4669_v41 }
 0x8a6   : > { %v2257_v14 = vsub.f32 %v5158_v16, %v2163_v12  ;;  %v4680_v40 = vpop.eup %3528 }
 0x8a7   : > { %2480 = vadd.xlane.f32.xlu1 %v2479_v48  ;;  %v4690_v12 = vpop.eup %3530  ;;  %v2464_v48 = vadd.f32 %v4680_v40, %v4676_v10 }
 0x8a8   : > { %v2324_v51 = vmul.f32 1.442695, %v2257_v14  ;;  %5161 = vst [vmem:[#allocation10_spill] sm:$0xff] %v4690_v12  ;;  %v4694_v49 = vpop.eup %3532 }
 0x8a9   : > { %2471 = vadd.xlane.f32.xlu0 %v2470_v24  ;;  %v4696_v39 = vpop.eup %3534  ;;  %v2458_v61 = vadd.f32 %v4694_v49, %v4690_v12 }
 0x8aa   : > { %3556 = vpow2.f32 %v2324_v51  ;;  %v4700_v58 = vpop.eup %3536 }
 0x8ab   : > { %2216 = vmax.xlane.f32.xlu1 %v2215_v44  ;;  %v4702_v24 = vpop.eup %3538  ;;  %v2467_v44 = vadd.f32 %v4700_v58, %v4696_v39 }
 0x8ac   : > { %5162 = vst [vmem:[#allocation12_spill] sm:$0xff] %v4702_v24  ;;  %v4706_v53 = vpop.eup %3540 }
 0x8ad   : > { %2207 = vmax.xlane.f32.xlu0 %v2206_v7  ;;  %5163 = vst [vmem:[#allocation11_spill] sm:$0xff] %v4706_v53  ;;  %v4708_v18 = vpop.eup %3542  ;;  %v2452_v14 = vadd.f32 %v4706_v53, %v4702_v24 }
 0x8ae   : > { %5164 = vst [vmem:[#allocation6_spill] sm:$0xff] %v4708_v18  ;;  %v4712_v50 = vpop.eup %3544 }
 0x8af   : > { %2474 = vadd.xlane.f32.xlu1 %v2473_v17  ;;  %v4714_v16 = vpop.eup %3546  ;;  %v2461_v27 = vadd.f32 %v4712_v50, %v4708_v18 }
 0x8b0   : > { %5165 = vst [vmem:[#allocation7_spill] sm:$0xff] %v4714_v16  ;;  %v4718_v7 = vpop.eup %3548 }
 0x8b1   : > { %2465 = vadd.xlane.f32.xlu0 %v2464_v48  ;;  %5166 = vst [vmem:[#allocation14_spill] sm:$0xff] %v4718_v7  ;;  %v4720_v46 = vpop.eup %3550  ;;  %v2446_v17 = vadd.f32 %v4718_v7, %v4714_v16 }
 0x8b2   : > { %5167 = vst [vmem:[#allocation13_spill] sm:$0xff] %v4720_v46  ;;  %v4724_v33 = vpop.eup %3552 }
 0x8b3   : > { %2210 = vmax.xlane.f32.xlu1 %v2209_v6  ;;  %5168 = vst [vmem:[#allocation8_spill] sm:$0xff] %v4724_v33  ;;  %v5169_v6 = vld [vmem:[#allocation15_spill] sm:$0xff] }
 0x8b5   : > { %2459 = vadd.xlane.f32.xlu0 %v2458_v61 }
 0x8b7   : > { %2468 = vadd.xlane.f32.xlu1 %v2467_v44  ;;  %v4730_v44 = vpop.eup %3554 }
 0x8b8   : > { %v4734_v24 = vpop.eup %3556 }
 0x8b9   : > { %2453 = vadd.xlane.f32.xlu0 %v2452_v14  ;;  %v2455_v14 = vadd.f32 %v4724_v33, %v4720_v46 }
 0x8bb   : > { %2462 = vadd.xlane.f32.xlu1 %v2461_v27  ;;  %v2250_v51 = vpop.xlane.xlu0 %2249 }
 0x8bc   : > { %v2314_v48 = vsub.f32 %v4477_v62, %v2250_v51  ;;  %v2315_v61 = vsub.f32 %v5169_v6, %v2250_v51  ;;  %v2449_v6 = vadd.f32 %v4734_v24, %v4730_v44 }
 0x8bd   : > { %2447 = vadd.xlane.f32.xlu0 %v2446_v17 }
 0x8be   : > { %v2438_v53 = vmul.f32 1.442695, %v2314_v48  ;;  %v2440_v12 = vmul.f32 1.442695, %v2315_v61 }
 0x8bf   : > { %2456 = vadd.xlane.f32.xlu1 %v2455_v14  ;;  %v2244_v27 = vpop.xlane.xlu0 %2243  ;;  %v2253_v18 = vpop.xlane.xlu1 %2252 }
 0x8c0   : > { %3558 = vpow2.f32 %v2438_v53  ;;  %v2310_v16 = vsub.f32 %v4479_v36, %v2244_v27  ;;  %v2311_v62 = vsub.f32 %v4481_v28, %v2244_v27  ;;  %v2316_v51 = vsub.f32 %v4485_v42, %v2253_v18 }
 0x8c1   : > { %3560 = vpow2.f32 %v2440_v12  ;;  %v2317_v17 = vsub.f32 %v4497_v45, %v2253_v18 }
 0x8c2   : > { %v2430_v7 = vmul.f32 1.442695, %v2310_v16  ;;  %v2432_v46 = vmul.f32 1.442695, %v2311_v62  ;;  %v2442_v48 = vmul.f32 1.442695, %v2316_v51 }
 0x8c3   : > { %v2444_v61 = vmul.f32 1.442695, %v2317_v17  ;;  %2450 = vadd.xlane.f32.xlu1 %v2449_v6  ;;  %v2238_v14 = vpop.xlane.xlu0 %2237  ;;  %v2247_v33 = vpop.xlane.xlu1 %2246  ;;  %v5170_v51 = vld [vmem:[#allocation16_spill] sm:$0xff]  ;;  %v5171_v17 = vld [vmem:[#allocation17_spill] sm:$0xff] }
 0x8c4   : > { %3562 = vpow2.f32 %v2430_v7  ;;  %v2306_v36 = vsub.f32 %v4489_v22, %v2238_v14  ;;  %v2307_v28 = vsub.f32 %v4491_v0, %v2238_v14  ;;  %v2312_v42 = vsub.f32 %v4493_v60, %v2247_v33  ;;  %v5172_v60 = vld [vmem:[#allocation18_spill] sm:$0xff]  ;;  %v5173_v14 = vld [vmem:[#allocation19_spill] sm:$0xff] }
 0x8c5   : > { %3564 = vpow2.f32 %v2432_v46  ;;  %v2313_v45 = vsub.f32 %v4495_v57, %v2247_v33 }
 0x8c6   : > { %3566 = vpow2.f32 %v2442_v48  ;;  %v2422_v12 = vmul.f32 1.442695, %v2306_v36  ;;  %v2424_v53 = vmul.f32 1.442695, %v2307_v28  ;;  %v2434_v18 = vmul.f32 1.442695, %v2312_v42 }
 0x8c7   : > { %3568 = vpow2.f32 %v2444_v61  ;;  %v2436_v16 = vmul.f32 1.442695, %v2313_v45  ;;  %v2232_v27 = vpop.xlane.xlu0 %2231  ;;  %v2241_v62 = vpop.xlane.xlu1 %2240  ;;  %v5174_v28 = vld [vmem:[#allocation20_spill] sm:$0xff] }
 0x8c8   : > { %3570 = vpow2.f32 %v2422_v12  ;;  %v2302_v7 = vsub.f32 %v4503_v26, %v2232_v27  ;;  %v2303_v22 = vsub.f32 %v5170_v51, %v2232_v27  ;;  %v2308_v0 = vsub.f32 %v5171_v17, %v2241_v62 }
 0x8c9   : > { %3572 = vpow2.f32 %v2424_v53  ;;  %v2309_v46 = vsub.f32 %v5172_v60, %v2241_v62 }
 0x8ca   : > { %3574 = vpow2.f32 %v2434_v18  ;;  %v2414_v57 = vmul.f32 1.442695, %v2302_v7  ;;  %v2416_v33 = vmul.f32 1.442695, %v2303_v22  ;;  %v2426_v6 = vmul.f32 1.442695, %v2308_v0 }
 0x8cb   : > { %3576 = vpow2.f32 %v2436_v16  ;;  %v2428_v48 = vmul.f32 1.442695, %v2309_v46  ;;  %v2235_v61 = vpop.xlane.xlu1 %2234 }
 0x8cc   : > { %3578 = vpow2.f32 %v2414_v57  ;;  %v2304_v36 = vsub.f32 %v5173_v14, %v2235_v61  ;;  %v2305_v42 = vsub.f32 %v5174_v28, %v2235_v61 }
 0x8cd   : > { %v4752_v26 = vpop.eup %3558  ;;  %3580 = vpow2.f32 %v2416_v33 }
 0x8ce   : > { %v4754_v45 = vpop.eup %3560  ;;  %3582 = vpow2.f32 %v2426_v6  ;;  %v2418_v12 = vmul.f32 1.442695, %v2304_v36  ;;  %v2420_v53 = vmul.f32 1.442695, %v2305_v42 }
 0x8cf   : > { %3584 = vpow2.f32 %v2428_v48  ;;  %v2536_v18 = vadd.f32 %v4754_v45, %v4752_v26 }
 0x8d0   : > { %3586 = vpow2.f32 %v2418_v12 }
 0x8d1   : > { %v4758_v16 = vpop.eup %3562  ;;  %3588 = vpow2.f32 %v2420_v53  ;;  %2537 = vadd.xlane.f32.xlu0 %v2536_v18 }
 0x8d2   : > { %v4760_v27 = vpop.eup %3564 }
 0x8d3   : > { %v4762_v62 = vpop.eup %3566  ;;  %v2530_v7 = vadd.f32 %v4760_v27, %v4758_v16 }
 0x8d4   : > { %v4766_v51 = vpop.eup %3568 }
 0x8d5   : > { %v4768_v22 = vpop.eup %3570  ;;  %2531 = vadd.xlane.f32.xlu0 %v2530_v7  ;;  %v2539_v17 = vadd.f32 %v4766_v51, %v4762_v62 }
 0x8d6   : > { %5175 = vst [vmem:[#allocation9_spill] sm:$0xff] %v4768_v22  ;;  %v4772_v0 = vpop.eup %3572 }
 0x8d7   : > { %v4774_v60 = vpop.eup %3574  ;;  %2540 = vadd.xlane.f32.xlu1 %v2539_v17  ;;  %v2524_v46 = vadd.f32 %v4772_v0, %v4768_v22 }
 0x8d8   : > { %v4778_v57 = vpop.eup %3576 }
 0x8d9   : > { %v4780_v33 = vpop.eup %3578  ;;  %2525 = vadd.xlane.f32.xlu0 %v2524_v46  ;;  %v2533_v6 = vadd.f32 %v4778_v57, %v4774_v60 }
 0x8da   : > { %5176 = vst [vmem:[#allocation15_spill] sm:$0xff] %v4780_v33  ;;  %v4784_v48 = vpop.eup %3580 }
 0x8db   : > { %5177 = vst [vmem:[#allocation16_spill] sm:$0xff] %v4784_v48  ;;  %v4786_v61 = vpop.eup %3582  ;;  %2534 = vadd.xlane.f32.xlu1 %v2533_v6  ;;  %v2518_v14 = vadd.f32 %v4784_v48, %v4780_v33 }
 0x8dc   : > { %5178 = vst [vmem:[#allocation17_spill] sm:$0xff] %v4786_v61  ;;  %v4790_v36 = vpop.eup %3584 }
 0x8dd   : > { %v4792_v28 = vpop.eup %3586  ;;  %2519 = vadd.xlane.f32.xlu0 %v2518_v14  ;;  %v2527_v42 = vadd.f32 %v4790_v36, %v4786_v61 }
 0x8de   : > { %5179 = vst [vmem:[#allocation18_spill] sm:$0xff] %v4792_v28  ;;  %v4796_v12 = vpop.eup %3588 }
 0x8df   : > { %5180 = vst [vmem:[#allocation19_spill] sm:$0xff] %v4796_v12  ;;  %2528 = vadd.xlane.f32.xlu1 %v2527_v42  ;;  %v2521_v53 = vadd.f32 %v4796_v12, %v4792_v28 }
 0x8e3   : > { %2522 = vadd.xlane.f32.xlu1 %v2521_v53 }
 0x91a   : > { %v2490_v18 = vpop.xlane.xlu0 %2489 }
 0x91b   : > { %3590 = vrcp.f32 %v2490_v18 }
 0x91e   : > { %v2226_v7 = vpop.xlane.xlu0 %2225 }
 0x91f   : > { %v2298_v17 = vsub.f32 %v4557_v23, %v2226_v7  ;;  %v2299_v46 = vsub.f32 %v4561_v55, %v2226_v7 }
 0x920   : > { %v2493_v6 = vpop.xlane.xlu1 %2492 }
 0x921   : > { %v2406_v33 = vmul.f32 1.442695, %v2298_v17  ;;  %v2408_v14 = vmul.f32 1.442695, %v2299_v46  ;;  %3592 = vrcp.f32 %v2493_v6 }
 0x922   : > { %v2484_v48 = vpop.xlane.xlu0 %2483 }
 0x923   : > { %3594 = vpow2.f32 %v2406_v33 }
 0x924   : > { %3596 = vpow2.f32 %v2408_v14  ;;  %v2229_v22 = vpop.xlane.xlu1 %2228 }
 0x925   : > { %v2300_v42 = vsub.f32 %v4577_v20, %v2229_v22  ;;  %v2301_v28 = vsub.f32 %v4581_v31, %v2229_v22  ;;  %3598 = vrcp.f32 %v2484_v48 }
 0x926   : > { %v2220_v53 = vpop.xlane.xlu0 %2219 }
 0x927   : > { %v2410_v12 = vmul.f32 1.442695, %v2300_v42  ;;  %v2412_v18 = vmul.f32 1.442695, %v2301_v28  ;;  %v2294_v61 = vsub.f32 %v4587_v1, %v2220_v53  ;;  %v2295_v23 = vsub.f32 %v4591_v54, %v2220_v53 }
 0x928   : > { %v2487_v55 = vpop.xlane.xlu1 %2486  ;;  %v3591_v46 = vpop.eup %3590 }
 0x929   : > { %3600 = vpow2.f32 %v2410_v12  ;;  %v2398_v7 = vmul.f32 1.442695, %v2294_v61  ;;  %v2400_v17 = vmul.f32 1.442695, %v2295_v23  ;;  %v2603_v54 = vmul.f32 %v3591_v46, %v4554_v4 }
 0x92a   : > { %3602 = vpow2.f32 %v2412_v18  ;;  %v2478_v33 = vpop.xlane.xlu0 %2477 }
 0x92b   : > { %3604 = vpow2.f32 %v2398_v7 }
 0x92c   : > { %3606 = vpow2.f32 %v2400_v17  ;;  %v2223_v20 = vpop.xlane.xlu1 %2222 }
 0x92d   : > { %3608 = vrcp.f32 %v2487_v55  ;;  %v2296_v31 = vsub.f32 %v4614_v19, %v2223_v20  ;;  %v2297_v22 = vsub.f32 %v4618_v43, %v2223_v20  ;;  %v2602_v19 = vmul.f32 %v3591_v46, %v4551_v2 }
 0x92e   : > { %v3593_v28 = vpop.eup %3592  ;;  %v2214_v1 = vpop.xlane.xlu0 %2213  ;;  %3610 = vrcp.f32 %v2478_v33 }
 0x92f   : > { %v2402_v48 = vmul.f32 1.442695, %v2296_v31  ;;  %v2404_v6 = vmul.f32 1.442695, %v2297_v22  ;;  %v2290_v61 = vsub.f32 %v4611_v30, %v2214_v1  ;;  %v2291_v12 = vsub.f32 %v4624_v63, %v2214_v1 }
 0x930   : > { %v4811_v14 = vpop.eup %3594  ;;  %v2481_v42 = vpop.xlane.xlu1 %2480  ;;  %v2605_v53 = vmul.f32 %v3593_v28, %v4574_v29  ;;  %v2604_v43 = vmul.f32 %v3593_v28, %v4570_v59 }
 0x931   : > { %v4816_v18 = vpop.eup %3596  ;;  %3612 = vpow2.f32 %v2402_v48  ;;  %v2390_v4 = vmul.f32 1.442695, %v2290_v61  ;;  %v2392_v23 = vmul.f32 1.442695, %v2291_v12 }
 0x932   : > { %3614 = vpow2.f32 %v2404_v6  ;;  %v2653_v55 = vpack.c.bf16 %v2605_v53, %v2603_v54  ;;  %v2472_v30 = vpop.xlane.xlu0 %2471  ;;  %v2652_v7 = vpack.c.bf16 %v2604_v43, %v2602_v19  ;;  %v2512_v63 = vadd.f32 %v4816_v18, %v4811_v14  ;;  %v3599_v2 = vpop.eup %3598 }
 0x933   : > { %3616 = vpow2.f32 %v2390_v4  ;;  %v2598_v19 = vmul.f32 %v3599_v2, %v4566_v32 }
 0x934   : > { %3618 = vpow2.f32 %v2392_v23  ;;  %2710 = vmatprep.subr.bf16.mxu0 %v2653_v55  ;;  %v2217_v29 = vpop.xlane.xlu1 %2216  ;;  %2513 = vadd.xlane.f32.xlu0 %v2512_v63 }
 0x935   : > { %3620 = vrcp.f32 %v2481_v42  ;;  %2711 = vmatpush1.bf16.xpose.msra.mxu0 %v2652_v7  ;;  %v2292_v59 = vsub.f32 %v4647_v5, %v2217_v29  ;;  %v2293_v17 = vsub.f32 %v4653_v9, %v2217_v29  ;;  %v2599_v42 = vmul.f32 %v3599_v2, %v4568_v52 }
 0x936   : > { %v4822_v33 = vpop.eup %3600  ;;  %v2208_v46 = vpop.xlane.xlu0 %2207  ;;  %3622 = vrcp.f32 %v2472_v30 }
 0x937   : > { %v4824_v20 = vpop.eup %3602  ;;  %v2394_v31 = vmul.f32 1.442695, %v2292_v59  ;;  %v2396_v22 = vmul.f32 1.442695, %v2293_v17  ;;  %v2286_v28 = vsub.f32 %v4661_v13, %v2208_v46  ;;  %v2287_v1 = vsub.f32 %v4664_v3, %v2208_v46 }
 0x938   : > { %v4828_v54 = vpop.eup %3604  ;;  %v2475_v48 = vpop.xlane.xlu1 %2474  ;;  %v2515_v5 = vadd.f32 %v4824_v20, %v4822_v33 }
 0x939   : > { %v4832_v6 = vpop.eup %3606  ;;  %3624 = vpow2.f32 %v2394_v31  ;;  %v2382_v9 = vmul.f32 1.442695, %v2286_v28  ;;  %v2384_v61 = vmul.f32 1.442695, %v2287_v1 }
 0x93a   : > { %v3609_v12 = vpop.eup %3608  ;;  %3626 = vpow2.f32 %v2396_v22  ;;  %2516 = vadd.xlane.f32.xlu1 %v2515_v5  ;;  %v2466_v13 = vpop.xlane.xlu0 %2465  ;;  %v2506_v3 = vadd.f32 %v4832_v6, %v4828_v54 }
 0x93b   : > { %3628 = vpow2.f32 %v2382_v9  ;;  %v2601_v53 = vmul.f32 %v3609_v12, %v4600_v34  ;;  %v2600_v43 = vmul.f32 %v3609_v12, %v4596_v11  ;;  %v3611_v23 = vpop.eup %3610 }
 0x93c   : > { %3630 = vpow2.f32 %v2384_v61  ;;  %v2211_v4 = vpop.xlane.xlu1 %2210  ;;  %2507 = vadd.xlane.f32.xlu0 %v2506_v3  ;;  %v2594_v28 = vmul.f32 %v3611_v23, %v4603_v38 }
 0x93d   : > { %3632 = vrcp.f32 %v2475_v48  ;;  %v2651_v55 = vpack.c.bf16 %v2601_v53, %v2599_v42  ;;  %v2650_v30 = vpack.c.bf16 %v2600_v43, %v2598_v19  ;;  %v2288_v52 = vsub.f32 %v4683_v47, %v2211_v4 }
 0x93e   : > { %v4841_v7 = vpop.eup %3612  ;;  %v2289_v63 = vsub.f32 %v4686_v37, %v2211_v4  ;;  %v2460_v29 = vpop.xlane.xlu0 %2459  ;;  %3634 = vrcp.f32 %v2466_v13  ;;  %v2595_v37 = vmul.f32 %v3611_v23, %v4608_v56 }
 0x93f   : > { %v4844_v59 = vpop.eup %3614  ;;  %2712 = vmatprep.subr.bf16.mxu0 %v2651_v55  ;;  %v2386_v32 = vmul.f32 1.442695, %v2288_v52  ;;  %3636 = vrcp.f32 %v2460_v29 }
 0x940   : > { %v4846_v11 = vpop.eup %3616  ;;  %2713 = vmatpush1.bf16.xpose.msra.mxu0 %v2650_v30  ;;  %v2388_v34 = vmul.f32 1.442695, %v2289_v63  ;;  %v2469_v2 = vpop.xlane.xlu1 %2468  ;;  %v2509_v17 = vadd.f32 %v4844_v59, %v4841_v7 }
 0x941   : > { %v4850_v47 = vpop.eup %3618  ;;  %3638 = vpow2.f32 %v2386_v32 }
 0x942   : > { %v3621_v46 = vpop.eup %3620  ;;  %3640 = vpow2.f32 %v2388_v34  ;;  %2510 = vadd.xlane.f32.xlu1 %v2509_v17  ;;  %v2500_v31 = vadd.f32 %v4850_v47, %v4846_v11  ;;  %v2454_v3 = vpop.xlane.xlu0 %2453 }
 0x943   : > { %3642 = vrcp.f32 %v2469_v2  ;;  %v2597_v22 = vmul.f32 %v3621_v46, %v4636_v35  ;;  %v2596_v1 = vmul.f32 %v3621_v46, %v4631_v21  ;;  %v3623_v5 = vpop.eup %3622 }
 0x944   : > { %v2463_v48 = vpop.xlane.xlu1 %2462  ;;  %2501 = vadd.xlane.f32.xlu0 %v2500_v31  ;;  %v2591_v53 = vmul.f32 %v3623_v5, %v4650_v8  ;;  %v2590_v4 = vmul.f32 %v3623_v5, %v4644_v25  ;;  %v5181_v5 = vld [vmem:[#allocation6_spill] sm:$0xff] }
 0x945   : > { %v2649_v9 = vpack.c.bf16 %v2597_v22, %v2595_v37  ;;  %v2648_v61 = vpack.c.bf16 %v2596_v1, %v2594_v28  ;;  %3644 = vrcp.f32 %v2463_v48 }
 0x946   : > { %v4858_v12 = vpop.eup %3624  ;;  %v2448_v46 = vpop.xlane.xlu0 %2447 }
 0x947   : > { %v4860_v42 = vpop.eup %3626  ;;  %2714 = vmatprep.subr.bf16.mxu0 %v2649_v9 }
 0x948   : > { %v4862_v56 = vpop.eup %3628  ;;  %2715 = vmatpush1.bf16.xpose.msra.mxu0 %v2648_v61  ;;  %v2457_v13 = vpop.xlane.xlu1 %2456  ;;  %v2503_v38 = vadd.f32 %v4860_v42, %v4858_v12  ;;  %v5182_v61 = vld [vmem:[#allocation8_spill] sm:$0xff] }
 0x949   : > { %v4866_v35 = vpop.eup %3630  ;;  %3646 = vrcp.f32 %v2457_v13 }
 0x94a   : > { %v3633_v21 = vpop.eup %3632  ;;  %2504 = vadd.xlane.f32.xlu1 %v2503_v38  ;;  %v2494_v19 = vadd.f32 %v4866_v35, %v4862_v56  ;;  %3648 = vrcp.f32 %v2454_v3 }
 0x94b   : > { %v2593_v43 = vmul.f32 %v3633_v21, %v4674_v15  ;;  %v2592_v23 = vmul.f32 %v3633_v21, %v4669_v41  ;;  %v3635_v55 = vpop.eup %3634  ;;  %v5184_v21 = vld [vmem:[#allocation11_spill] sm:$0xff] }
 0x94c   : > { %2495 = vadd.xlane.f32.xlu0 %v2494_v19  ;;  %v3637_v30 = vpop.eup %3636  ;;  %v2451_v34 = vpop.xlane.xlu1 %2450  ;;  %v2587_v25 = vmul.f32 %v3635_v55, %v4680_v40  ;;  %v2586_v37 = vmul.f32 %v3635_v55, %v4676_v10  ;;  %v5183_v10 = vld [vmem:[#allocation10_spill] sm:$0xff] }
 0x94d   : > { %v2647_v52 = vpack.c.bf16 %v2593_v43, %v2591_v53  ;;  %v2646_v63 = vpack.c.bf16 %v2592_v23, %v2590_v4  ;;  %3650 = vrcp.f32 %v2451_v34  ;;  %v2583_v22 = vmul.f32 %v3637_v30, %v4694_v49  ;;  %v1166_v53 = vld [vmem:[%s5103_s6 + $0x80] sm:$0xff]  ;;  %v1167_v23 = vld [vmem:[%s5103_s6 + $0x88] sm:$0xff]  ;;  %v5186_v34 = vld [vmem:[#allocation12_spill] sm:$0xff] }
 0x94e   : > { %v4874_v29 = vpop.eup %3638  ;;  %3652 = vrcp.f32 %v2448_v46  ;;  %v2582_v38 = vmul.f32 %v3637_v30, %v5183_v10  ;;  %v5185_v30 = vld [vmem:[#allocation13_spill] sm:$0xff] }
 0x94f   : > { %v4876_v32 = vpop.eup %3640  ;;  %2716 = vmatprep.subr.bf16.mxu0 %v2647_v52 }
 0x950   : > { %v3643_v8 = vpop.eup %3642  ;;  %2717 = vmatpush1.bf16.xpose.msra.mxu0 %v2646_v63  ;;  %v2497_v15 = vadd.f32 %v4876_v32, %v4874_v29 }
 0x951   : > { %v2589_v41 = vmul.f32 %v3643_v8, %v4700_v58  ;;  %v2588_v2 = vmul.f32 %v3643_v8, %v4696_v39  ;;  %v1169_v8 = vld [vmem:[%s5103_s6 + $0x98] sm:$0xff] }
 0x952   : > { %v3645_v17 = vpop.eup %3644  ;;  %2498 = vadd.xlane.f32.xlu1 %v2497_v15 }
 0x953   : > { %v2645_v31 = vpack.c.bf16 %v2589_v41, %v2587_v25  ;;  %v2585_v28 = vmul.f32 %v3645_v17, %v4712_v50  ;;  %v2644_v1 = vpack.c.bf16 %v2588_v2, %v2586_v37  ;;  %v2584_v9 = vmul.f32 %v3645_v17, %v5181_v5  ;;  %v1168_v41 = vld [vmem:[%s5103_s6 + $0x90] sm:$0xff]  ;;  %v5187_v2 = vld [vmem:[#allocation14_spill] sm:$0xff] }
 0x954   : > { %v1172_v5 = vld [vmem:[%s5103_s6 + $0xb0] sm:$0xff] }
 0x955   : > { %2718 = vmatprep.subr.bf16.mxu0 %v2645_v31  ;;  %v2643_v48 = vpack.c.bf16 %v2585_v28, %v2583_v22  ;;  %v2642_v49 = vpack.c.bf16 %v2584_v9, %v2582_v38  ;;  %v1170_v22 = vld [vmem:[%s5103_s6 + $0xa0] sm:$0xff] }
 0x956   : > { %v3647_v40 = vpop.eup %3646 }
 0x957   : > { %v3649_v58 = vpop.eup %3648  ;;  %v2581_v13 = vmul.f32 %v3647_v40, %v5182_v61  ;;  %v2580_v52 = vmul.f32 %v3647_v40, %v5185_v30 }
 0x958   : > { %2719 = vmatpush1.bf16.xpose.msra.mxu0 %v2644_v1  ;;  %v2579_v3 = vmul.f32 %v3649_v58, %v5184_v21  ;;  %v2578_v15 = vmul.f32 %v3649_v58, %v5186_v34  ;;  %v5188_v58 = vld [vmem:[#allocation7_spill] sm:$0xff] }
 0x959   : > { %2720 = vmatprep.subr.bf16.mxu0 %v2643_v48  ;;  %v1173_v48 = vld [vmem:[%s5103_s6 + $0xb8] sm:$0xff] }
 0x95a   : > { %v2538_v39 = vpop.xlane.xlu0 %2537  ;;  %v2641_v50 = vpack.c.bf16 %v2581_v13, %v2579_v3  ;;  %v3651_v19 = vpop.eup %3650  ;;  %v2640_v46 = vpack.c.bf16 %v2580_v52, %v2578_v15  ;;  %v2799_v3 = vld [vmem:[%s5105_s8] sm:$0xff]  ;;  %v2805_v15 = vld [vmem:[%s5105_s8 + $0x30] sm:$0xff] }
 0x95b   : > { %3654 = vrcp.f32 %v2538_v39  ;;  %v3653_v55 = vpop.eup %3652  ;;  %v2577_v63 = vmul.f32 %v3651_v19, %v4734_v24  ;;  %v1171_v24 = vld [vmem:[%s5103_s6 + $0xa8] sm:$0xff]  ;;  %v2576_v1 = vmul.f32 %v3651_v19, %v4730_v44 }
 0x95c   : > { %v2575_v17 = vmul.f32 %v3653_v55, %v5187_v2  ;;  %v2574_v39 = vmul.f32 %v3653_v55, %v5188_v58  ;;  %v2800_v44 = vld [vmem:[%s5105_s8 + $0x8] sm:$0xff] }
 0x95d   : > { %v5194_v58 = vld [vmem:[#allocation15_spill] sm:$0xff] }
 0x95e   : > { %v2532_v43 = vpop.xlane.xlu0 %2531  ;;  %v2639_v37 = vpack.c.bf16 %v2577_v63, %v2575_v17  ;;  %v2638_v61 = vpack.c.bf16 %v2576_v1, %v2574_v39  ;;  %v5189_v17 = vld [vmem:[#allocation17_spill] sm:$0xff] }
 0x960   : > { %2721 = vmatpush1.bf16.xpose.msra.mxu0 %v2642_v49  ;;  %v2541_v4 = vpop.xlane.xlu1 %2540 }
 0x961   : > { %2722 = vmatprep.subr.bf16.mxu0 %v2641_v50  ;;  %3656 = vrcp.f32 %v2541_v4 }
 0x962   : > { %1256 = vperm.xlu0 %3468, %v1166_v53   ;;  %3658 = vrcp.f32 %v2532_v43  ;;  %v2526_v28 = vpop.xlane.xlu0 %2525 }
 0x963   : > { %1261 = vperm.xlu1 %3469, %v1167_v23  }
 0x964   : > { %v2535_v25 = vpop.xlane.xlu1 %2534 }
 0x965   : > { %3660 = vrcp.f32 %v2535_v25 }
 0x966   : > { %1271 = vperm.xlu0 %3468, %v1169_v8   ;;  %v2520_v19 = vpop.xlane.xlu0 %2519  ;;  %v2806_v8 = vld [vmem:[%s5105_s8 + $0x38] sm:$0xff] }
 0x967   : > { %1266 = vperm.xlu1 %3469, %v1168_v41  }
 0x968   : > { %2723 = vmatpush1.bf16.xpose.msra.mxu0 %v2640_v46  ;;  %v2529_v31 = vpop.xlane.xlu1 %2528  ;;  %v3655_v40 = vpop.eup %3654 }
 0x969   : > { %2724 = vmatprep.subr.bf16.mxu0 %v2639_v37  ;;  %3662 = vrcp.f32 %v2529_v31  ;;  %v2635_v13 = vmul.f32 %v3655_v40, %v4754_v45  ;;  %v2634_v43 = vmul.f32 %v3655_v40, %v4752_v26  ;;  %v2802_v45 = vld [vmem:[%s5105_s8 + $0x18] sm:$0xff]  ;;  %v2804_v26 = vld [vmem:[%s5105_s8 + $0x28] sm:$0xff] }
 0x96a   : > { %1281 = vperm.xlu0 %3468, %v1171_v24   ;;  %3664 = vrcp.f32 %v2526_v28  ;;  %v5190_v37 = vld [vmem:[#allocation19_spill] sm:$0xff]  ;;  %v5191_v31 = vld [vmem:[#allocation9_spill] sm:$0xff] }
 0x96b   : > { %1276 = vperm.xlu1 %3469, %v1170_v22   ;;  %v5192_v22 = vld [vmem:[#allocation16_spill] sm:$0xff] }
 0x96c   : > { %v2523_v21 = vpop.xlane.xlu1 %2522 }
 0x96d   : > { %3666 = vrcp.f32 %v2523_v21 }
 0x96e   : > { %v3657_v9 = vpop.eup %3656  ;;  %1291 = vperm.xlu0 %3468, %v1173_v48   ;;  %3668 = vrcp.f32 %v2520_v19 }
 0x96f   : > { %1286 = vperm.xlu1 %3469, %v1172_v5   ;;  %v2637_v10 = vmul.f32 %v3657_v9, %v4766_v51  ;;  %v3659_v38 = vpop.eup %3658  ;;  %v2636_v49 = vmul.f32 %v3657_v9, %v4762_v62  ;;  %v2801_v62 = vld [vmem:[%s5105_s8 + $0x10] sm:$0xff] }
 0x970   : > { %2725 = vmatpush1.bf16.xpose.msra.mxu0 %v2638_v61  ;;  %v2631_v51 = vmul.f32 %v3659_v38, %v4760_v27  ;;  %v2803_v27 = vld [vmem:[%s5105_s8 + $0x20] sm:$0xff]  ;;  %v2630_v34 = vmul.f32 %v3659_v38, %v4758_v16  ;;  %v4960_v61 = vpop.f32.mrf.mxu0 }
 0x971   : > { %v2669_v50 = vpack.c.bf16 %v2637_v10, %v2635_v13  ;;  %v2668_v23 = vpack.c.bf16 %v2636_v49, %v2634_v43 }
 0x972   : > { %v3661_v53 = vpop.eup %3660  ;;  %2814 = vperm.xlu0 %3468, %v2800_v44   ;;  %v1506_v13 = vpop.f32.mrf.mxu0 }
 0x973   : > { %2809 = vperm.xlu1 %3469, %v2799_v3   ;;  %2726 = vmatprep.subr.bf16.mxu0 %v2669_v50  ;;  %v2633_v4 = vmul.f32 %v3661_v53, %v4778_v57  ;;  %v2632_v52 = vmul.f32 %v3661_v53, %v4774_v60 }
 0x974   : > { %v4962_v38 = vpop.f32.mrf.mxu0 }
 0x975   : > { %v2667_v55 = vpack.c.bf16 %v2633_v4, %v2631_v51  ;;  %v2666_v41 = vpack.c.bf16 %v2632_v52, %v2630_v34 }
 0x976   : > { %2824 = vperm.xlu0 %3468, %v2802_v45   ;;  %v3663_v30 = vpop.eup %3662  ;;  %v1510_v3 = vpop.f32.mrf.mxu0 }
 0x977   : > { %2819 = vperm.xlu1 %3469, %v2801_v62   ;;  %v3665_v57 = vpop.eup %3664  ;;  %v2629_v63 = vmul.f32 %v3663_v30, %v4790_v36  ;;  %v2628_v46 = vmul.f32 %v3663_v30, %v5189_v17 }
 0x978   : > { %2727 = vmatpush2.bf16.xpose.msra.mxu0 %v2668_v23  ;;  %v2627_v25 = vmul.f32 %v3665_v57, %v4772_v0  ;;  %v2626_v16 = vmul.f32 %v3665_v57, %v5191_v31  ;;  %v5193_v0 = vld [vmem:[#allocation18_spill] sm:$0xff]  ;;  %v4964_v19 = vpop.f32.mrf.mxu0 }
 0x979   : > { %2728 = vmatprep.subr.bf16.mxu0 %v2667_v55 }
 0x97a   : > { %2834 = vperm.xlu0 %3468, %v2804_v26   ;;  %v2665_v2 = vpack.c.bf16 %v2629_v63, %v2627_v25  ;;  %v3667_v60 = vpop.eup %3666  ;;  %v2664_v1 = vpack.c.bf16 %v2628_v46, %v2626_v16  ;;  %v1516_v26 = vpop.f32.mrf.mxu0 }
 0x97b   : > { %2829 = vperm.xlu1 %3469, %v2803_v27   ;;  %v3669_v36 = vpop.eup %3668  ;;  %v2625_v24 = vmul.f32 %v3667_v60, %v5190_v37  ;;  %v2624_v40 = vmul.f32 %v3667_v60, %v5193_v0 }
 0x97c   : > { %v2623_v28 = vmul.f32 %v3669_v36, %v5192_v22  ;;  %v2622_v39 = vmul.f32 %v3669_v36, %v5194_v58  ;;  %v1518_v52 = vpop.f32.mrf.mxu0 }
 0x97e   : > { %2844 = vperm.xlu0 %3468, %v2806_v8   ;;  %v2663_v48 = vpack.c.bf16 %v2625_v24, %v2623_v28  ;;  %v2662_v5 = vpack.c.bf16 %v2624_v40, %v2622_v39  ;;  %v1520_v25 = vpop.f32.mrf.mxu0 }
 0x97f   : > { %2839 = vperm.xlu1 %3469, %v2805_v15  }
 0x980   : > { %2729 = vmatpush2.bf16.xpose.msra.mxu0 %v2666_v41  ;;  %v1524_v17 = vpop.f32.mrf.mxu0 }
 0x981   : > { %2730 = vmatprep.subr.bf16.mxu0 %v2665_v2 }
 0x982   : > { %v1526_v16 = vpop.f32.mrf.mxu0 }
 0x988   : > { %2731 = vmatpush2.bf16.xpose.msra.mxu0 %v2664_v1  ;;  %v1528_v1 = vpop.f32.mrf.mxu0 }
 0x989   : > { %2732 = vmatprep.subr.bf16.mxu0 %v2663_v48 }
 0x990   : > { %2733 = vmatpush2.bf16.xpose.msra.mxu0 %v2662_v5 }
 0x9bd   : > { %v2514_v9 = vpop.xlane.xlu0 %2513 }
 0x9be   : > { %3670 = vrcp.f32 %v2514_v9 }
 0x9c3   : > { %v2517_v44 = vpop.xlane.xlu1 %2516 }
 0x9c4   : > { %3672 = vrcp.f32 %v2517_v44 }
 0x9c5   : > { %v2508_v10 = vpop.xlane.xlu0 %2507 }
 0x9c6   : > { %3674 = vrcp.f32 %v2508_v10 }
 0x9cb   : > { %v2511_v21 = vpop.xlane.xlu1 %2510  ;;  %v3671_v49 = vpop.eup %3670 }
 0x9cc   : > { %3676 = vrcp.f32 %v2511_v21  ;;  %v2619_v43 = vmul.f32 %v3671_v49, %v4816_v18  ;;  %v2618_v51 = vmul.f32 %v3671_v49, %v4811_v14 }
 0x9cd   : > { %v2502_v50 = vpop.xlane.xlu0 %2501 }
 0x9ce   : > { %3678 = vrcp.f32 %v2502_v50 }
 0x9d1   : > { %v3673_v53 = vpop.eup %3672 }
 0x9d2   : > { %v2621_v45 = vmul.f32 %v3673_v53, %v4824_v20  ;;  %v2620_v4 = vmul.f32 %v3673_v53, %v4822_v33 }
 0x9d3   : > { %v2505_v23 = vpop.xlane.xlu1 %2504  ;;  %v3675_v30 = vpop.eup %3674 }
 0x9d4   : > { %3680 = vrcp.f32 %v2505_v23  ;;  %v2661_v62 = vpack.c.bf16 %v2621_v45, %v2619_v43  ;;  %v2660_v55 = vpack.c.bf16 %v2620_v4, %v2618_v51  ;;  %v2615_v18 = vmul.f32 %v3675_v30, %v4832_v6 }
 0x9d5   : > { %v2496_v27 = vpop.xlane.xlu0 %2495  ;;  %v2614_v14 = vmul.f32 %v3675_v30, %v4828_v54 }
 0x9d6   : > { %2734 = vmatprep.subr.bf16.mxu0 %v2661_v62  ;;  %3682 = vrcp.f32 %v2496_v27 }
 0x9d7   : > { %2735 = vmatpush2.bf16.xpose.msra.mxu0 %v2660_v55 }
 0x9d9   : > { %v3677_v57 = vpop.eup %3676 }
 0x9da   : > { %v2617_v20 = vmul.f32 %v3677_v57, %v4844_v59  ;;  %v2616_v33 = vmul.f32 %v3677_v57, %v4841_v7 }
 0x9db   : > { %v2499_v63 = vpop.xlane.xlu1 %2498  ;;  %v3679_v60 = vpop.eup %3678 }
 0x9dc   : > { %3684 = vrcp.f32 %v2499_v63  ;;  %v2659_v8 = vpack.c.bf16 %v2617_v20, %v2615_v18  ;;  %v2658_v34 = vpack.c.bf16 %v2616_v33, %v2614_v14  ;;  %v2611_v54 = vmul.f32 %v3679_v60, %v4850_v47 }
 0x9dd   : > { %v1257_v15 = vpop.permute.xlu0 %1256  ;;  %v2610_v46 = vmul.f32 %v3679_v60, %v4846_v11 }
 0x9de   : > { %2736 = vmatprep.subr.bf16.mxu0 %v2659_v8  ;;  %v1507_v41 = vadd.f32 %v1506_v13, %v1257_v15  ;;  %v1505_v5 = vadd.f32 %v4960_v61, %v1257_v15 }
 0x9df   : > { %2737 = vmatpush2.bf16.xpose.msra.mxu0 %v2658_v34  ;;  %v1262_v2 = vpop.permute.xlu1 %1261 }
 0x9e0   : > { %v1511_v36 = vadd.f32 %v1510_v3, %v1262_v2  ;;  %v1509_v9 = vadd.f32 %v4962_v38, %v1262_v2 }
 0x9e1   : > { %v3681_v6 = vpop.eup %3680  ;;  %v1272_v58 = vpop.permute.xlu0 %1271 }
 0x9e2   : > { %v3271_v59 = vpack.c.bf16 %v1511_v36, %v1507_v41  ;;  %v2613_v7 = vmul.f32 %v3681_v6, %v4860_v42  ;;  %v2612_v37 = vmul.f32 %v3681_v6, %v4858_v12  ;;  %v1530_v12 = vpop.f32.mrf.mxu0  ;;  %v1521_v44 = vadd.f32 %v1520_v25, %v1272_v58 }
 0x9e3   : > { %v3683_v22 = vpop.eup %3682  ;;  %v1267_v39 = vpop.permute.xlu1 %1266  ;;  %v3270_v10 = vpack.c.bf16 %v1509_v9, %v1505_v5 }
 0x9e4   : > { %2742 = vmatprep.mubr.bf16.mxu0 %v3271_v59  ;;  %v2657_v24 = vpack.c.bf16 %v2613_v7, %v2611_v54  ;;  %v2656_v31 = vpack.c.bf16 %v2612_v37, %v2610_v46  ;;  %v2607_v48 = vmul.f32 %v3683_v22, %v4866_v35  ;;  %v2606_v47 = vmul.f32 %v3683_v22, %v4862_v56  ;;  %v1534_v35 = vpop.f32.mrf.mxu0 }
 0x9e5   : > { %v1517_v13 = vadd.f32 %v1516_v26, %v1267_v39  ;;  %v1282_v56 = vpop.permute.xlu0 %1281  ;;  %v1515_v49 = vadd.f32 %v4964_v19, %v1267_v39  ;;  %v2955_v39 = vld [vmem:[%s3878_s27 + $0x8] sm:$0xff] }
 0x9e6   : > { %2738 = vmatprep.subr.bf16.mxu0 %v2657_v24  ;;  %v1536_v21 = vpop.f32.mrf.mxu0  ;;  %v1531_v50 = vadd.f32 %v1530_v12, %v1282_v56  ;;  %v1529_v23 = vadd.f32 %v1528_v1, %v1282_v56  ;;  %v5195_v1 = vmov 0   ;;  %v2957_v56 = vld [vmem:[%s3878_s27 + $0x18] sm:$0xff] }
 0x9e7   : > { %2739 = vmatpush2.bf16.xpose.msra.mxu0 %v2656_v31  ;;  %v1277_v3 = vpop.permute.xlu1 %1276 }
 0x9e8   : > { %v1527_v53 = vadd.f32 %v1526_v16, %v1277_v3  ;;  %v1538_v43 = vpop.f32.mrf.mxu0  ;;  %v1525_v62 = vadd.f32 %v1524_v17, %v1277_v3 }
 0x9e9   : > { %v3685_v28 = vpop.eup %3684  ;;  %v1292_v38 = vpop.permute.xlu0 %1291 }
 0x9ea   : > { %v2609_v0 = vmul.f32 %v3685_v28, %v4876_v32  ;;  %v2608_v42 = vmul.f32 %v3685_v28, %v4874_v29  ;;  %v3273_v32 = vpack.c.bf16 %v1521_v44, %v1517_v13  ;;  %v1519_v29 = vadd.f32 %v1518_v52, %v1272_v58  ;;  %v1540_v51 = vpop.f32.mrf.mxu0  ;;  %v3482_v28 = vld [vmem:[%s5104_s7] sm:$0xff]  }
 0x9eb   : > { %v3275_v61 = vpack.c.bf16 %v1531_v50, %v1527_v53  ;;  %v1287_v4 = vpop.permute.xlu1 %1286  ;;  %v1541_v55 = vadd.f32 %v1540_v51, %v1292_v38  ;;  %v3274_v30 = vpack.c.bf16 %v1529_v23, %v1525_v62  ;;  %v1539_v57 = vadd.f32 %v1538_v43, %v1292_v38  ;;  %v2958_v53 = vld [vmem:[%s3878_s27 + $0x20] sm:$0xff]  ;;  %v2959_v51 = vld [vmem:[%s3878_s27 + $0x28] sm:$0xff] }
 0x9ec   : > { %v2655_v11 = vpack.c.bf16 %v2609_v0, %v2607_v48  ;;  %v2654_v40 = vpack.c.bf16 %v2608_v42, %v2606_v47  ;;  %v3272_v45 = vpack.c.bf16 %v1519_v29, %v1515_v49  ;;  %v1537_v26 = vadd.f32 %v1536_v21, %v1287_v4  ;;  %v3483_v48 = vld [vmem:[%s5104_s7 + $0x8] sm:$0xff]   ;;  %v3484_v0 = vld [vmem:[%s5104_s7 + $0x10] sm:$0xff]   ;;  %v3485_v47 = vld [vmem:[%s5104_s7 + $0x18] sm:$0xff]  }
 0x9ed   : > { %v1535_v19 = vadd.f32 %v1534_v35, %v1287_v4  ;;  %v2815_v44 = vpop.permute.xlu0 %2814  ;;  %v2956_v35 = vld [vmem:[%s3878_s27 + $0x10] sm:$0xff] }
 0x9ee   : > { %2740 = vmatprep.subr.bf16.mxu0 %v2655_v11  ;;  %v3277_v27 = vpack.c.bf16 %v1541_v55, %v1537_v26  ;;  %v2960_v55 = vld [vmem:[%s3878_s27 + $0x30] sm:$0xff] }
 0x9ef   : > { %2741 = vmatpush2.bf16.xpose.msra.mxu0 %v2654_v40  ;;  %v3276_v52 = vpack.c.bf16 %v1539_v57, %v1535_v19  ;;  %v2810_v42 = vpop.permute.xlu1 %2809  ;;  %v2954_v40 = vld [vmem:[%s3878_s27] sm:$0xff]  ;;  %v2961_v57 = vld [vmem:[%s3878_s27 + $0x38] sm:$0xff] }
 0x9f1   : > { %v2825_v23 = vpop.permute.xlu0 %2824 }
 0x9f3   : > { %v2820_v49 = vpop.permute.xlu1 %2819 }
 0x9f6   : > { %2743 = vmatmul.mubr.bf16.vlgmr.msra.gmra.mxu0 %v3270_v10 }
 0x9f7   : > { %2752 = vmatprep.mubr.bf16.mxu0 %v3273_v32 }
 0x9fe   : > { %2753 = vmatmul.mubr.bf16.gmra.mxu0 %v3272_v45 }
 0x9ff   : > { %2762 = vmatprep.mubr.bf16.mxu0 %v3275_v61 }
 0xa06   : > { %2763 = vmatmul.mubr.bf16.gmra.mxu0 %v3274_v30 }
 0xa07   : > { %2772 = vmatprep.mubr.bf16.mxu0 %v3277_v27 }
 0xa0e   : > { %2773 = vmatmul.mubr.bf16.gmra.mxu0 %v3276_v52 }
 0xab6   : > { %v2744_v18 = vpop.f32.mrf.mxu0 }
 0xab8   : > { %v2746_v20 = vpop.f32.mrf.mxu0 }
 0xaba   : > { %v2748_v14 = vpop.f32.mrf.mxu0 }
 0xabb   : > { %v2791_v22 = vpack.c.bf16 %v2748_v14, %v2744_v18  ;;  %v2830_v18 = vpop.permute.xlu1 %2829  ;;  %v2962_v14 = vld [vmem:[%s3878_s27 + $0x40] sm:$0xff] }
 0xabc   : > { %v2750_v33 = vpop.f32.mrf.mxu0 }
 0xabd   : > { %v2792_v16 = vpack.c.bf16 %v2750_v33, %v2746_v20 }
 0xabe   : > { %v2754_v63 = vpop.f32.mrf.mxu0 }
 0xac0   : > { %v2756_v8 = vpop.f32.mrf.mxu0 }
 0xac2   : > { %v2758_v34 = vpop.f32.mrf.mxu0 }
 0xac3   : > { %v2793_v31 = vpack.c.bf16 %v2758_v34, %v2754_v63  ;;  %v2963_v34 = vld [vmem:[%s3878_s27 + $0x48] sm:$0xff] }
 0xac4   : > { %v2760_v15 = vpop.f32.mrf.mxu0 }
 0xac5   : > { %v2794_v24 = vpack.c.bf16 %v2760_v15, %v2756_v8 }
 0xac6   : > { %v2764_v25 = vpop.f32.mrf.mxu0 }
 0xac8   : > { %v2766_v41 = vpop.f32.mrf.mxu0 }
 0xaca   : > { %v2768_v2 = vpop.f32.mrf.mxu0 }
 0xacb   : > { %v2795_v37 = vpack.c.bf16 %v2768_v2, %v2764_v25 }
 0xacc   : > { %v2770_v60 = vpop.f32.mrf.mxu0 }
 0xacd   : > { %v2796_v46 = vpack.c.bf16 %v2770_v60, %v2766_v41  ;;  %v2835_v41 = vpop.permute.xlu0 %2834  ;;  %v2964_v60 = vld [vmem:[%s3878_s27 + $0x50] sm:$0xff] }
 0xace   : > { %v2774_v36 = vpop.f32.mrf.mxu0 }
 0xad0   : > { %v2776_v6 = vpop.f32.mrf.mxu0 }
 0xad2   : > { %v2778_v17 = vpop.f32.mrf.mxu0 }
 0xad3   : > { %v2797_v7 = vpack.c.bf16 %v2778_v17, %v2774_v36 }
 0xad4   : > { %v2780_v59 = vpop.f32.mrf.mxu0 }
 0xad5   : > { %v2798_v54 = vpack.c.bf16 %v2780_v59, %v2776_v6  ;;  %v2965_v59 = vld [vmem:[%s3878_s27 + $0x58] sm:$0xff] }
 0xad7   : > { %2887 = vmatprep.subr.bf16.mxu1 %v2798_v54 }
 0xad8   : > { %2888 = vmatpush1.bf16.msra.mxu1 %v2797_v7 }
 0xad9   : > { %2889 = vmatprep.subr.bf16.mxu1 %v2796_v46  ;;  %v2840_v46 = vpop.permute.xlu1 %2839 }
 0xadc   : > { %2890 = vmatpush1.bf16.msra.mxu1 %v2795_v37 }
 0xadd   : > { %2891 = vmatprep.subr.bf16.mxu1 %v2794_v24  ;;  %v2966_v24 = vld [vmem:[%s3878_s27 + $0x60] sm:$0xff] }
 0xae0   : > { %2892 = vmatpush1.bf16.msra.mxu1 %v2793_v31 }
 0xae1   : > { %2893 = vmatprep.subr.bf16.mxu1 %v2792_v16 }
 0xae4   : > { %2894 = vmatpush1.bf16.msra.mxu1 %v2791_v22 }
 0xae7   : > { %3219 = vmatmul.mubr.msk.bf16.vlgmr.msra.gmra.mxu1 %vm395_vm0, %v3482_v28  ;;  %v2967_v28 = vld [vmem:[%s3878_s27 + $0x68] sm:$0xff] }
 0xae8   : > { %2921 = vmatprep.mubr.bf16.mxu1 %v5195_v1 }
 0xaef   : > { %3220 = vmatmul.mubr.msk.bf16.gmra.mxu1 %vm395_vm0, %v3483_v48 }
 0xaf0   : > { %2931 = vmatprep.mubr.bf16.mxu1 %v5195_v1 }
 0xaf7   : > { %3221 = vmatmul.mubr.msk.bf16.gmra.mxu1 %vm395_vm0, %v3484_v0  ;;  %v2845_v0 = vpop.permute.xlu0 %2844 }
 0xaf8   : > { %2941 = vmatprep.mubr.bf16.mxu1 %v5195_v1 }
 0xaff   : > { %3222 = vmatmul.mubr.msk.bf16.gmra.mxu1 %vm395_vm0, %v3485_v47 }
 0xba7   : > { %v2913_v11 = vpop.f32.mrf.mxu1 }
 0xba8   : > { %v2914_v12 = vadd.f32 %v2913_v11, %v2810_v42 }
 0xba9   : > { %v2915_v58 = vpop.f32.mrf.mxu1 }
 0xbaa   : > { %v2970_v5 = vadd.f32 %v2954_v40, %v2914_v12  ;;  %v2916_v9 = vadd.f32 %v2915_v58, %v2810_v42  ;;  %v2968_v42 = vld [vmem:[%s3878_s27 + $0x70] sm:$0xff]  ;;  %v2969_v58 = vld [vmem:[%s3878_s27 + $0x78] sm:$0xff]  ;;  %s3686_s27 = scalar_lea.vmem %s5046_s23, 2048 }
 0xbab   : > { %v2917_v13 = vpop.f32.mrf.mxu1  ;;  %p3687_p12 = scmp.ne.s32.totalorder %s5046_s23, %s3686_s27  ;;  %p3694_p2 = scmp.lt.s32.totalorder %s3692_s16, %s3686_s27 }
 0xbac   : > { %2986 = vst [vmem:[%s5010_s18] sm:$0xff] %v2970_v5  ;;  %v2971_v10 = vadd.f32 %v2955_v39, %v2916_v9  ;;  %v2918_v32 = vadd.f32 %v2917_v13, %v2815_v44 }
 0xbad   : > { %v2919_v21 = vpop.f32.mrf.mxu1  ;;  %p3688_p13 = pnand %p3687_p12, %p3858_p4  ;;  %p3695_p3 = por %p3694_p2, %p3693_p1 }
 0xbae   : > { %2987 = vst [vmem:[%s5010_s18 + $0x8] sm:$0xff] %v2971_v10  ;;  %v2972_v3 = vadd.f32 %v2956_v35, %v2918_v32  ;;  %v2920_v29 = vadd.f32 %v2919_v21, %v2815_v44 }
 0xbaf   : > { %v2923_v50 = vpop.f32.mrf.mxu1  ;;  %p3689_p0 = pneg %p3688_p13 }
 0xbb0   : > { %2988 = vst [vmem:[%s5010_s18 + $0x10] sm:$0xff] %v2972_v3  ;;  %v2973_v43 = vadd.f32 %v2957_v56, %v2920_v29  ;;  %v2924_v45 = vadd.f32 %v2923_v50, %v2820_v49 }
 0xbb1   : > { %v2925_v61 = vpop.f32.mrf.mxu1  ;;  %p3696_p5 = pnand %p3695_p3, %p3689_p0 }
 0xbb2   : > { %2989 = vst [vmem:[%s5010_s18 + $0x18] sm:$0xff] %v2973_v43  ;;  %v2974_v38 = vadd.f32 %v2958_v53, %v2924_v45  ;;  %v2926_v4 = vadd.f32 %v2925_v61, %v2820_v49 }
 0xbb3   : > { %v2927_v62 = vpop.f32.mrf.mxu1 }
 0xbb4   : > { %2990 = vst [vmem:[%s5010_s18 + $0x20] sm:$0xff] %v2974_v38  ;;  %v2975_v26 = vadd.f32 %v2959_v51, %v2926_v4  ;;  %v2928_v30 = vadd.f32 %v2927_v62, %v2825_v23 }
 0xbb5   : > { %v2929_v27 = vpop.f32.mrf.mxu1 }
 0xbb6   : > { %2991 = vst [vmem:[%s5010_s18 + $0x28] sm:$0xff] %v2975_v26  ;;  %v2976_v19 = vadd.f32 %v2960_v55, %v2928_v30  ;;  %v2930_v52 = vadd.f32 %v2929_v27, %v2825_v23 }
 0xbb7   : > { %v2933_v20 = vpop.f32.mrf.mxu1 }
 0xbb8   : > { %2992 = vst [vmem:[%s5010_s18 + $0x30] sm:$0xff] %v2976_v19  ;;  %v2977_v33 = vadd.f32 %v2961_v57, %v2930_v52  ;;  %v2934_v63 = vadd.f32 %v2933_v20, %v2830_v18 }
 0xbb9   : > { %v2935_v8 = vpop.f32.mrf.mxu1 }
 0xbba   : > { %2993 = vst [vmem:[%s5010_s18 + $0x38] sm:$0xff] %v2977_v33  ;;  %v2978_v15 = vadd.f32 %v2962_v14, %v2934_v63  ;;  %v2936_v25 = vadd.f32 %v2935_v8, %v2830_v18 }
 0xbbb   : > { %v2937_v2 = vpop.f32.mrf.mxu1 }
 0xbbc   : > { %2994 = vst [vmem:[%s5010_s18 + $0x40] sm:$0xff] %v2978_v15  ;;  %v2979_v36 = vadd.f32 %v2963_v34, %v2936_v25  ;;  %v2938_v6 = vadd.f32 %v2937_v2, %v2835_v41 }
 0xbbd   : > { %v2939_v17 = vpop.f32.mrf.mxu1 }
 0xbbe   : > { %2995 = vst [vmem:[%s5010_s18 + $0x48] sm:$0xff] %v2979_v36  ;;  %v2980_v54 = vadd.f32 %v2964_v60, %v2938_v6  ;;  %v2940_v7 = vadd.f32 %v2939_v17, %v2835_v41 }
 0xbbf   : > { %v2943_v37 = vpop.f32.mrf.mxu1 }
 0xbc0   : > { %2996 = vst [vmem:[%s5010_s18 + $0x50] sm:$0xff] %v2980_v54  ;;  %v2981_v31 = vadd.f32 %v2965_v59, %v2940_v7  ;;  %v2944_v16 = vadd.f32 %v2943_v37, %v2840_v46 }
 0xbc1   : > { %v2945_v22 = vpop.f32.mrf.mxu1 }
 0xbc2   : > { %2997 = vst [vmem:[%s5010_s18 + $0x58] sm:$0xff] %v2981_v31  ;;  %v2982_v1 = vadd.f32 %v2966_v24, %v2944_v16  ;;  %v2946_v48 = vadd.f32 %v2945_v22, %v2840_v46 }
 0xbc3   : > { %v2947_v47 = vpop.f32.mrf.mxu1 }
 0xbc4   : > { %2998 = vst [vmem:[%s5010_s18 + $0x60] sm:$0xff] %v2982_v1  ;;  %v2983_v11 = vadd.f32 %v2967_v28, %v2946_v48  ;;  %v2948_v40 = vadd.f32 %v2947_v47, %v2845_v0 }
 0xbc5   : > { %v2949_v12 = vpop.f32.mrf.mxu1 }
 0xbc6   : > { %2999 = vst [vmem:[%s5010_s18 + $0x68] sm:$0xff] %v2983_v11  ;;  %v2984_v39 = vadd.f32 %v2968_v42, %v2948_v40  ;;  %v2950_v5 = vadd.f32 %v2949_v12, %v2845_v0 }
 0xbc8   : > { %3000 = vst [vmem:[%s5010_s18 + $0x70] sm:$0xff] %v2984_v39  ;;  %v2985_v9 = vadd.f32 %v2969_v58, %v2950_v5 }
 0xbca   : > { %3001 = vst [vmem:[%s5010_s18 + $0x78] sm:$0xff] %v2985_v9 }
 0xbcb   : > { %3699 = shalt.err (!%p3696_p5)
}
 0xbcc   : > { %s3700_s15 = scalar_lea.hbm %s5044_s26, 2048  ;;  %s3704_s24 = scalar_lea.hbm %s5106_s9, 4096 }
 0xbcd   : > { %p3701_p6 = scmp.ne.s32.totalorder %s5044_s26, %s3700_s15  ;;  %p3705_p10 = scmp.lt.s32.totalorder %s5044_s26, %s5106_s9 }
 0xbce   : > { %p3706_p11 = scmp.lt.s32.totalorder %s3704_s24, %s3700_s15 }
 0xbcf   : > { %p3702_p7 = pnand %p3701_p6, %p3858_p4 }
 0xbd0   : > { %p3707_p12 = por %p3706_p11, %p3705_p10 }
 0xbd1   : > { %p3703_p9 = pneg %p3702_p7 }
 0xbd3   : > { %p3708_p13 = pnand %p3707_p12, %p3703_p9 }
 0xbd5   : > { %3711 = shalt.err (!%p3708_p13)
}
 0xbd6   : > { %s3766_s27 = smov 256   ;;  %s3767_s29 = smov 16  }
 0xbd7   : > { %3410 = dma.vmem_to_hbm [thread:$0]  (%p3858_p4), %s5046_s23, 2048, %s5044_s26, %s5052_s12, %s3766_s27, %s3766_s27, %s3767_s29  }
 0xbd8 PF: > { %p3416_p0 = scmp.ge.s32.totalorder %s3762_s14, 2  ;;  %s3033_s16 = sand.u32 1, %s3742_s30  }
 0xbd9   : > { %s3034_s15 = scalar_lea.sflag [#allocation4], %s3033_s16 }
 0xbda   : > { %p3413_p1 = pnand %p3416_p0, %p3865_p8 }
 0xbdc   : > { %p3414_p2 = pneg %p3413_p1 }
 0xbde   : > { %3737 = dma.done.wait (%p3414_p2), %s3034_s15, 2048  }
 0xbdf   : > { %3739 = vsyncadd (%p3414_p2), %s3034_s15, 4294965248  ;;  %s22_s14 = sadd.s32 1, %s3762_s14   ;;  %s5196_s30 = smov %s3746_s10 }
 0xbe0   : > { %p19_p3 = scmp.ge.s32.totalorder %s22_s14, 4   ;;  %s5197_s10 = smov %s3750_s11 }
 0xbe1   : > { %s5198_s11 = smov %s3871_s22  ;;  %s5199_s12 = smov %s3758_s13 }
 0xbe2   : > { %s5200_s13 = smov %s5202_s17  ;;  %21 = sbr.rel (!%p19_p3) target bundleno = 4 (0x4), region = 97 }
 0xbe7   :  { %3039 = vsyncpa [#allocation4], 1 }
 0xbe8   :  { %3041 = vsyncpa [#allocation4 + $0x1], 1 }

</bundles_post_ra>
